<compile_context>
chip_gen: v5e
topology: v5e:2x2
jax: 0.10.0
libtpu: 0.0.40
codegen_flags: <defaults>
</compile_context>

<pallas_src>
import functools

import jax
import jax.numpy as jnp
from jax.experimental import pallas as pl
from jax.experimental.pallas import tpu as pltpu


# ----------------------------------------------------------------------------
# helpers
# ----------------------------------------------------------------------------
def _round_up(x, m):
    return ((x + m - 1) // m) * m


def _pick_tile(dim, target):
    """Largest multiple of 128 that divides `dim` (itself a multiple of 128), <= target."""
    t = max(128, (min(target, dim) // 128) * 128)
    while dim % t:
        t -= 128
    return t


def _vmem_capacity_bytes():
    # Generation-aware tiling: v5e/v6e have 128 MiB VMEM per core, v7x has 64 MiB.
    try:
        return int(pltpu.get_tpu_info().vmem_capacity_bytes)
    except Exception:
        return 64 << 20  # conservative default (v7x-sized)


# ----------------------------------------------------------------------------
# Encoder kernels
# ----------------------------------------------------------------------------
def _project_kernel(x_ref, w_self_ref, w_nbr_ref, b_ref, s_ref, p_ref):
    # S = X @ W_self + b   (self term, bias folded here)
    # P = X @ W_nbr        (neighbor projection; aggregated by the next kernel)
    x = x_ref[...]
    s_ref[...] = (jnp.dot(x, w_self_ref[...], preferred_element_type=jnp.float32)
                  + b_ref[...])
    p_ref[...] = jnp.dot(x, w_nbr_ref[...], preferred_element_type=jnp.float32)


def _aggregate_kernel(a_ref, p_ref, s_ref, h_ref, acc_ref):
    # H = tanh(S + A @ P), reduction over A's column tiles (grid axis 1, last).
    k = pl.program_id(1)

    @pl.when(k == 0)
    def _():
        acc_ref[...] = s_ref[...]

    acc_ref[...] += jnp.dot(a_ref[...], p_ref[...],
                            preferred_element_type=jnp.float32)

    @pl.when(k == pl.num_programs(1) - 1)
    def _():
        h_ref[...] = jnp.tanh(acc_ref[...])


def encoder_forward(x, adj, w_self, w_nbr, b):
    N, F = x.shape
    D = w_self.shape[1]
    vmem_cap = _vmem_capacity_bytes()
    # A-tile targets: (512, 2048) f32 on 128 MiB VMEM (v5e/v6e),
    #                 (256, 1024) f32 on 64 MiB VMEM (v7x).
    tm_t, tk_t = (512, 2048) if vmem_cap >= (100 << 20) else (256, 1024)

    n_pad = _round_up(max(N, 128), 128)
    x_p = jnp.pad(x, ((0, n_pad - N), (0, 0)))
    adj_p = jnp.pad(adj, ((0, n_pad - N), (0, n_pad - N)))

    # --- stage 1: per-node projections P and S, row-tiled -------------------
    tr = _pick_tile(n_pad, 256)
    s_pad, p_pad = pl.pallas_call(
        _project_kernel,
        out_shape=(jax.ShapeDtypeStruct((n_pad, D), jnp.float32),
                   jax.ShapeDtypeStruct((n_pad, D), jnp.float32)),
        grid=(n_pad // tr,),
        in_specs=[pl.BlockSpec((tr, F), lambda i: (i, 0)),
                  pl.BlockSpec((F, D), lambda i: (0, 0)),
                  pl.BlockSpec((F, D), lambda i: (0, 0)),
                  pl.BlockSpec((1, D), lambda i: (0, 0))],
        out_specs=(pl.BlockSpec((tr, D), lambda i: (i, 0)),
                   pl.BlockSpec((tr, D), lambda i: (i, 0))),
        compiler_params=pltpu.CompilerParams(
            dimension_semantics=("parallel",)),
    )(x_p, w_self, w_nbr, b)

    # --- stage 2: aggregation H = tanh(S + A @ P) ----------------------------
    # NOTE: on v6e/v7x the A / P operands could be cast to bf16 (keeping the f32
    # accumulator) to halve HBM traffic; kept f32 here to match module numerics.
    tm = _pick_tile(n_pad, tm_t)
    tk = _pick_tile(n_pad, tk_t)
    # double-buffered A/P/S/out blocks + f32 accumulator scratch
    agg_bytes = 4 * (2 * tm * tk + 2 * tk * D + 4 * tm * D + tm * D)
    vmem_limit = int(min(max(2 * agg_bytes, 16 << 20), 48 << 20))

    h_pad = pl.pallas_call(
        _aggregate_kernel,
        out_shape=jax.ShapeDtypeStruct((n_pad, D), jnp.float32),
        grid=(n_pad // tm, n_pad // tk),
        in_specs=[pl.BlockSpec((tm, tk), lambda i, k: (i, k)),
                  pl.BlockSpec((tk, D), lambda i, k: (k, 0)),
                  pl.BlockSpec((tm, D), lambda i, k: (i, 0))],
        out_specs=pl.BlockSpec((tm, D), lambda i, k: (i, 0)),
        scratch_shapes=[pltpu.VMEM((tm, D), jnp.float32)],
        compiler_params=pltpu.CompilerParams(
            dimension_semantics=("parallel", "arbitrary"),
            vmem_limit_bytes=vmem_limit),
        cost_estimate=pl.CostEstimate(
            flops=2 * n_pad * n_pad * D,
            transcendentals=n_pad * D,
            bytes_accessed=4 * (n_pad * n_pad + 3 * n_pad * D)),
    )(adj_p, p_pad, s_pad)
    return h_pad[:N]


# ----------------------------------------------------------------------------
# Predictor kernel
# ----------------------------------------------------------------------------
def _predictor_kernel(hs_ref, hd_ref, w1s_ref, w1d_ref, b1_ref, w2_ref, b2_ref,
                      out_ref):
    hidden = (jnp.dot(hs_ref[...], w1s_ref[...], preferred_element_type=jnp.float32)
              + jnp.dot(hd_ref[...], w1d_ref[...], preferred_element_type=jnp.float32)
              + b1_ref[...])
    hidden = jnp.maximum(hidden, 0.0)                               # [TE, H]
    # [TE,H] @ [H,1] on the MXU wastes 127/128 lanes; use the VPU (broadcast
    # multiply) + XLU lane reduction instead.  b2 lives in SMEM.
    out_ref[...] = (jnp.sum(hidden * w2_ref[...], axis=-1, keepdims=True)
                    + b2_ref[0, 0])                                  # [TE, 1]


def predictor_forward(h_src, h_dst, w1s, w1d, b1, w2, b2):
    E, D = h_src.shape
    H = w1s.shape[1]
    e_pad = _round_up(max(E, 128), 128)
    te = _pick_tile(e_pad, 256)
    hs_p = jnp.pad(h_src, ((0, e_pad - E), (0, 0)))
    hd_p = jnp.pad(h_dst, ((0, e_pad - E), (0, 0)))
    w2_row = w2.reshape(1, H)
    b2_s = b2.reshape(1, 1)

    scores = pl.pallas_call(
        _predictor_kernel,
        out_shape=jax.ShapeDtypeStruct((e_pad, 1), jnp.float32),
        grid=(e_pad // te,),
        in_specs=[pl.BlockSpec((te, D), lambda i: (i, 0)),
                  pl.BlockSpec((te, D), lambda i: (i, 0)),
                  pl.BlockSpec((D, H), lambda i: (0, 0)),
                  pl.BlockSpec((D, H), lambda i: (0, 0)),
                  pl.BlockSpec((1, H), lambda i: (0, 0)),
                  pl.BlockSpec((1, H), lambda i: (0, 0)),
                  pl.BlockSpec(memory_space=pltpu.MemorySpace.SMEM)],
        out_specs=pl.BlockSpec((te, 1), lambda i: (i, 0)),
        compiler_params=pltpu.CompilerParams(
            dimension_semantics=("parallel",)),
    )(hs_p, hd_p, w1s, w1d, b1, w2_row, b2_s)
    return scores[:E, 0]


# ----------------------------------------------------------------------------
# IntegratedCitationModel forward (link-prediction path)
# ----------------------------------------------------------------------------
def init_params(key, in_feat, embed_dim, hidden_dim):
    ks = jax.random.split(key, 5)
    scale_e = 1.0 / jnp.sqrt(in_feat)
    scale_p = 1.0 / jnp.sqrt(embed_dim)
    return {
        "enc_w_self": jax.random.normal(ks[0], (in_feat, embed_dim), jnp.float32) * scale_e,
        "enc_w_nbr": jax.random.normal(ks[1], (in_feat, embed_dim), jnp.float32) * scale_e,
        "enc_b": jnp.zeros((1, embed_dim), jnp.float32),
        "pred_w1s": jax.random.normal(ks[2], (embed_dim, hidden_dim), jnp.float32) * scale_p,
        "pred_w1d": jax.random.normal(ks[3], (embed_dim, hidden_dim), jnp.float32) * scale_p,
        "pred_b1": jnp.zeros((1, hidden_dim), jnp.float32),
        "pred_w2": jax.random.normal(ks[4], (hidden_dim, 1), jnp.float32) / jnp.sqrt(hidden_dim),
        "pred_b2": jnp.zeros((1, 1), jnp.float32),
    }


def edge_index_to_dense_adj(edge_index, num_nodes):
    # Glue: dense row-normalized adjacency from [2, E] edge_index (src -> dst).
    # TODO(synk): for production-scale sparse citation graphs, replace the dense
    # [N,N] adjacency with a CSR / padded-neighbor-list aggregation driven by
    # PrefetchScalarGridSpec scalar prefetch so only O(E) neighbor rows are DMA'd.
    src, dst = edge_index[0], edge_index[1]
    adj = jnp.zeros((num_nodes, num_nodes), jnp.float32)
    adj = adj.at[dst, src].add(1.0)
    deg = jnp.maximum(adj.sum(axis=1, keepdims=True), 1.0)
    return adj / deg


@functools.partial(jax.jit, static_argnames=("num_nodes",))
def integrated_citation_model_forward(params, x, edge_index, num_nodes,
                                      pos_edge_index=None, neg_edge_index=None):
    """Mirrors IntegratedCitationModel.forward:
       embeddings = encoder(graph); pos/neg preds = predictor(embeddings, edges)."""
    adj = edge_index_to_dense_adj(edge_index, num_nodes)
    node_embeddings = encoder_forward(
        x, adj, params["enc_w_self"], params["enc_w_nbr"], params["enc_b"])

    if pos_edge_index is None:
        return {"embeddings": node_embeddings}

    # Score pos and neg edges in ONE kernel launch (better MXU/sublane fill,
    # half the dispatch overhead).
    if neg_edge_index is not None:
        eidx = jnp.concatenate([pos_edge_index, neg_edge_index], axis=1)
    else:
        eidx = pos_edge_index
    h_src = jnp.take(node_embeddings, eidx[0], axis=0)
    h_dst = jnp.take(node_embeddings, eidx[1], axis=0)
    scores = predictor_forward(
        h_src, h_dst, params["pred_w1s"], params["pred_w1d"],
        params["pred_b1"], params["pred_w2"], params["pred_b2"])

    n_pos = pos_edge_index.shape[1]
    out = {"pos_pred": scores[:n_pos]}
    if neg_edge_index is not None:
        out["neg_pred"] = scores[n_pos:]
    return out


if __name__ == "__main__":
    key = jax.random.PRNGKey(0)
    k_param, k_x, k_graph, k_pos, k_neg = jax.random.split(key, 5)

    # Small synthetic citation graph; embed/hidden dims are MXU-aligned and match
    # the PyTorch module defaults (embed_dim=128, hidden_dim=256).
    num_nodes = 24
    in_feat = 64
    embed_dim = 128
    hidden_dim = 256
    num_graph_edges = 96
    num_pred_edges = 12   # per polarity

    params = init_params(k_param, in_feat, embed_dim, hidden_dim)
    x = jax.random.normal(k_x, (num_nodes, in_feat), jnp.float32)
    edge_index = jax.random.randint(k_graph, (2, num_graph_edges), 0, num_nodes,
                                    dtype=jnp.int32)
    pos_edge_index = jax.random.randint(k_pos, (2, num_pred_edges), 0, num_nodes,
                                        dtype=jnp.int32)
    neg_edge_index = jax.random.randint(k_neg, (2, num_pred_edges), 0, num_nodes,
                                        dtype=jnp.int32)

    out = integrated_citation_model_forward(
        params, x, edge_index, num_nodes, pos_edge_index, neg_edge_index)
    jax.block_until_ready(out)

    emb_out = integrated_citation_model_forward(params, x, edge_index, num_nodes)
    jax.block_until_ready(emb_out)

    # Pure-JAX reference (same association: A @ (X @ W_nbr)).
    adj = edge_index_to_dense_adj(edge_index, num_nodes)
    emb_ref = jnp.tanh(x @ params["enc_w_self"]
                       + adj @ (x @ params["enc_w_nbr"])
                       + params["enc_b"])

    def ref_scores(eidx):
        hs = emb_ref[eidx[0]]
        hd = emb_ref[eidx[1]]
        hid = jnp.maximum(hs @ params["pred_w1s"] + hd @ params["pred_w1d"]
                          + params["pred_b1"], 0.0)
        return (jnp.sum(hid * params["pred_w2"].reshape(1, -1), axis=-1)
                + params["pred_b2"][0, 0])

    assert out["pos_pred"].shape == (num_pred_edges,)
    assert out["neg_pred"].shape == (num_pred_edges,)
    assert emb_out["embeddings"].shape == (num_nodes, embed_dim)
    assert jnp.allclose(emb_out["embeddings"], emb_ref, atol=1e-3, rtol=1e-3)
    assert jnp.allclose(out["pos_pred"], ref_scores(pos_edge_index), atol=1e-3, rtol=1e-3)
    assert jnp.allclose(out["neg_pred"], ref_scores(neg_edge_index), atol=1e-3, rtol=1e-3)

    # TODO(synk): the optional Generator (CVAE) branch of the module is not part
    # of forward() and is not implemented here.
    print("KERNEL_OK")
</pallas_src>

<mosaic_0001>
module attributes {stable_mosaic.version = 11 : i64} {
  func.func @_project_kernel(%arg0: i32, %arg1: memref<128x64xf32, #tpu.memory_space<vmem>>, %arg2: memref<64x128xf32, #tpu.memory_space<vmem>>, %arg3: memref<64x128xf32, #tpu.memory_space<vmem>>, %arg4: memref<1x128xf32, #tpu.memory_space<vmem>>, %arg5: memref<128x128xf32, #tpu.memory_space<vmem>>, %arg6: memref<128x128xf32, #tpu.memory_space<vmem>>) attributes {dimension_semantics = [#tpu.dimension_semantics<parallel>], iteration_bounds = array<i64: 1>, scalar_prefetch = 0 : i64, scratch_operands = 0 : i64, tpu.core_type = #tpu.core_type<tc>, window_params = [{transform_indices = @transform_0, window_bounds = array<i64: 128, 64>}, {pipeline_mode = #tpu.pipeline_mode<synchronous>, transform_indices = @transform_1, window_bounds = array<i64: 64, 128>}, {pipeline_mode = #tpu.pipeline_mode<synchronous>, transform_indices = @transform_2, window_bounds = array<i64: 64, 128>}, {pipeline_mode = #tpu.pipeline_mode<synchronous>, transform_indices = @transform_3, window_bounds = array<i64: 1, 128>}, {transform_indices = @transform_4, window_bounds = array<i64: 128, 128>}, {transform_indices = @transform_5, window_bounds = array<i64: 128, 128>}]} {
    %c0 = arith.constant 0 : index
    %c0_0 = arith.constant 0 : index
    %0 = vector.load %arg1[%c0, %c0_0] : memref<128x64xf32, #tpu.memory_space<vmem>>, vector<128x64xf32>
    %c0_1 = arith.constant 0 : index
    %c0_2 = arith.constant 0 : index
    %1 = vector.load %arg2[%c0_1, %c0_2] : memref<64x128xf32, #tpu.memory_space<vmem>>, vector<64x128xf32>
    %cst = arith.constant dense<0.000000e+00> : vector<128x128xf32>
    %2 = tpu.matmul %0, %1, %cst {dimension_numbers = #tpu.dot_dimension_numbers<[1], [0], [0], [1], [0, 0, 1, 1], [], []>} : vector<128x64xf32>, vector<64x128xf32>, vector<128x128xf32> -> vector<128x128xf32>
    %c0_3 = arith.constant 0 : index
    %c0_4 = arith.constant 0 : index
    %3 = vector.load %arg4[%c0_3, %c0_4] : memref<1x128xf32, #tpu.memory_space<vmem>>, vector<1x128xf32>
    %4 = vector.broadcast %3 : vector<1x128xf32> to vector<128x128xf32>
    %5 = arith.addf %2, %4 : vector<128x128xf32>
    %c0_5 = arith.constant 0 : index
    %c0_6 = arith.constant 0 : index
    %6 = vector.load %arg5[%c0_5, %c0_6] : memref<128x128xf32, #tpu.memory_space<vmem>>, vector<128x128xf32>
    tpu.vector_store %arg5[%c0_5, %c0_6], %5 {strides = array<i32>} : memref<128x128xf32, #tpu.memory_space<vmem>>, vector<128x128xf32>,
    %c0_7 = arith.constant 0 : index
    %c0_8 = arith.constant 0 : index
    %7 = vector.load %arg3[%c0_7, %c0_8] : memref<64x128xf32, #tpu.memory_space<vmem>>, vector<64x128xf32>
    %cst_9 = arith.constant dense<0.000000e+00> : vector<128x128xf32>
    %8 = tpu.matmul %0, %7, %cst_9 {dimension_numbers = #tpu.dot_dimension_numbers<[1], [0], [0], [1], [0, 0, 1, 1], [], []>} : vector<128x64xf32>, vector<64x128xf32>, vector<128x128xf32> -> vector<128x128xf32>
    %c0_10 = arith.constant 0 : index
    %c0_11 = arith.constant 0 : index
    %9 = vector.load %arg6[%c0_10, %c0_11] : memref<128x128xf32, #tpu.memory_space<vmem>>, vector<128x128xf32>
    tpu.vector_store %arg6[%c0_10, %c0_11], %8 {strides = array<i32>} : memref<128x128xf32, #tpu.memory_space<vmem>>, vector<128x128xf32>,
    return
  }
  func.func @transform_0(%arg0: i32) -> (i32, i32) {
    %c0_i32 = arith.constant 0 : i32
    %c0_i32_0 = arith.constant 0 : i32
    return %arg0, %c0_i32 : i32, i32
  }
  func.func @transform_1(%arg0: i32) -> (i32, i32) {
    %c0_i32 = arith.constant 0 : i32
    %c0_i32_0 = arith.constant 0 : i32
    %c0_i32_1 = arith.constant 0 : i32
    return %c0_i32, %c0_i32_0 : i32, i32
  }
  func.func @transform_2(%arg0: i32) -> (i32, i32) {
    %c0_i32 = arith.constant 0 : i32
    %c0_i32_0 = arith.constant 0 : i32
    %c0_i32_1 = arith.constant 0 : i32
    return %c0_i32, %c0_i32_0 : i32, i32
  }
  func.func @transform_3(%arg0: i32) -> (i32, i32) {
    %c0_i32 = arith.constant 0 : i32
    %c0_i32_0 = arith.constant 0 : i32
    %c0_i32_1 = arith.constant 0 : i32
    return %c0_i32, %c0_i32_0 : i32, i32
  }
  func.func @transform_4(%arg0: i32) -> (i32, i32) {
    %c0_i32 = arith.constant 0 : i32
    %c0_i32_0 = arith.constant 0 : i32
    return %arg0, %c0_i32 : i32, i32
  }
  func.func @transform_5(%arg0: i32) -> (i32, i32) {
    %c0_i32 = arith.constant 0 : i32
    %c0_i32_0 = arith.constant 0 : i32
    return %arg0, %c0_i32 : i32, i32
  }
}

module attributes {stable_mosaic.version = 11 : i64} {
  func.func @_aggregate_kernel(%arg0: i32, %arg1: i32, %arg2: memref<128x128xf32, #tpu.memory_space<vmem>>, %arg3: memref<128x128xf32, #tpu.memory_space<vmem>>, %arg4: memref<128x128xf32, #tpu.memory_space<vmem>>, %arg5: memref<128x128xf32, #tpu.memory_space<vmem>>, %arg6: memref<128x128xf32, #tpu.memory_space<vmem>>) attributes {dimension_semantics = [#tpu.dimension_semantics<parallel>, #tpu.dimension_semantics<arbitrary>], iteration_bounds = array<i64: 1, 1>, scalar_prefetch = 0 : i64, scratch_operands = 1 : i64, tpu.core_type = #tpu.core_type<tc>, window_params = [{transform_indices = @transform_0, window_bounds = array<i64: 128, 128>}, {transform_indices = @transform_1, window_bounds = array<i64: 128, 128>}, {transform_indices = @transform_2, window_bounds = array<i64: 128, 128>}, {transform_indices = @transform_3, window_bounds = array<i64: 128, 128>}]} {
    %c0_i32 = arith.constant 0 : i32
    %0 = arith.cmpi eq, %arg1, %c0_i32 : i32
    %1 = arith.extui %0 : i1 to i32
    %c0_i32_0 = arith.constant 0 : i32
    %2 = arith.cmpi ne, %1, %c0_i32_0 : i32
    scf.if %2 {
      %c0_10 = arith.constant 0 : index
      %c0_11 = arith.constant 0 : index
      %12 = vector.load %arg4[%c0_10, %c0_11] : memref<128x128xf32, #tpu.memory_space<vmem>>, vector<128x128xf32>
      %c0_12 = arith.constant 0 : index
      %c0_13 = arith.constant 0 : index
      %13 = vector.load %arg6[%c0_12, %c0_13] : memref<128x128xf32, #tpu.memory_space<vmem>>, vector<128x128xf32>
      tpu.vector_store %arg6[%c0_12, %c0_13], %12 {strides = array<i32>} : memref<128x128xf32, #tpu.memory_space<vmem>>, vector<128x128xf32>,
    } else {
    }
    %c0 = arith.constant 0 : index
    %c0_1 = arith.constant 0 : index
    %3 = vector.load %arg6[%c0, %c0_1] : memref<128x128xf32, #tpu.memory_space<vmem>>, vector<128x128xf32>
    %c0_2 = arith.constant 0 : index
    %c0_3 = arith.constant 0 : index
    %4 = vector.load %arg2[%c0_2, %c0_3] : memref<128x128xf32, #tpu.memory_space<vmem>>, vector<128x128xf32>
    %c0_4 = arith.constant 0 : index
    %c0_5 = arith.constant 0 : index
    %5 = vector.load %arg3[%c0_4, %c0_5] : memref<128x128xf32, #tpu.memory_space<vmem>>, vector<128x128xf32>
    %cst = arith.constant dense<0.000000e+00> : vector<128x128xf32>
    %6 = tpu.matmul %4, %5, %cst {dimension_numbers = #tpu.dot_dimension_numbers<[1], [0], [0], [1], [0, 0, 1, 1], [], []>} : vector<128x128xf32>, vector<128x128xf32>, vector<128x128xf32> -> vector<128x128xf32>
    %7 = arith.addf %3, %6 : vector<128x128xf32>
    %c0_6 = arith.constant 0 : index
    %c0_7 = arith.constant 0 : index
    %8 = vector.load %arg6[%c0_6, %c0_7] : memref<128x128xf32, #tpu.memory_space<vmem>>, vector<128x128xf32>
    tpu.vector_store %arg6[%c0_6, %c0_7], %7 {strides = array<i32>} : memref<128x128xf32, #tpu.memory_space<vmem>>, vector<128x128xf32>,
    %c0_i32_8 = arith.constant 0 : i32
    %9 = arith.cmpi eq, %arg1, %c0_i32_8 : i32
    %10 = arith.extui %9 : i1 to i32
    %c0_i32_9 = arith.constant 0 : i32
    %11 = arith.cmpi ne, %10, %c0_i32_9 : i32
    scf.if %11 {
      %c0_10 = arith.constant 0 : index
      %c0_11 = arith.constant 0 : index
      %12 = vector.load %arg6[%c0_10, %c0_11] : memref<128x128xf32, #tpu.memory_space<vmem>>, vector<128x128xf32>
      %13 = math.tanh %12 : vector<128x128xf32>
      %c0_12 = arith.constant 0 : index
      %c0_13 = arith.constant 0 : index
      %14 = vector.load %arg5[%c0_12, %c0_13] : memref<128x128xf32, #tpu.memory_space<vmem>>, vector<128x128xf32>
      tpu.vector_store %arg5[%c0_12, %c0_13], %13 {strides = array<i32>} : memref<128x128xf32, #tpu.memory_space<vmem>>, vector<128x128xf32>,
    } else {
    }
    return
  }
  func.func @transform_0(%arg0: i32, %arg1: i32) -> (i32, i32) {
    %c0_i32 = arith.constant 0 : i32
    return %arg0, %arg1 : i32, i32
  }
  func.func @transform_1(%arg0: i32, %arg1: i32) -> (i32, i32) {
    %c0_i32 = arith.constant 0 : i32
    %c0_i32_0 = arith.constant 0 : i32
    return %arg1, %c0_i32 : i32, i32
  }
  func.func @transform_2(%arg0: i32, %arg1: i32) -> (i32, i32) {
    %c0_i32 = arith.constant 0 : i32
    %c0_i32_0 = arith.constant 0 : i32
    return %arg0, %c0_i32 : i32, i32
  }
  func.func @transform_3(%arg0: i32, %arg1: i32) -> (i32, i32) {
    %c0_i32 = arith.constant 0 : i32
    %c0_i32_0 = arith.constant 0 : i32
    return %arg0, %c0_i32 : i32, i32
  }
}

module attributes {stable_mosaic.version = 11 : i64} {
  func.func @_predictor_kernel(%arg0: i32, %arg1: memref<128x128xf32, #tpu.memory_space<vmem>>, %arg2: memref<128x128xf32, #tpu.memory_space<vmem>>, %arg3: memref<128x256xf32, #tpu.memory_space<vmem>>, %arg4: memref<128x256xf32, #tpu.memory_space<vmem>>, %arg5: memref<1x256xf32, #tpu.memory_space<vmem>>, %arg6: memref<1x256xf32, #tpu.memory_space<vmem>>, %arg7: memref<1x1xf32, #tpu.memory_space<smem>>, %arg8: memref<128x1xf32, #tpu.memory_space<vmem>>) attributes {dimension_semantics = [#tpu.dimension_semantics<parallel>], iteration_bounds = array<i64: 1>, scalar_prefetch = 0 : i64, scratch_operands = 0 : i64, tpu.core_type = #tpu.core_type<tc>, window_params = [{transform_indices = @transform_0, window_bounds = array<i64: 128, 128>}, {transform_indices = @transform_1, window_bounds = array<i64: 128, 128>}, {pipeline_mode = #tpu.pipeline_mode<synchronous>, transform_indices = @transform_2, window_bounds = array<i64: 128, 256>}, {pipeline_mode = #tpu.pipeline_mode<synchronous>, transform_indices = @transform_3, window_bounds = array<i64: 128, 256>}, {pipeline_mode = #tpu.pipeline_mode<synchronous>, transform_indices = @transform_4, window_bounds = array<i64: 1, 256>}, {pipeline_mode = #tpu.pipeline_mode<synchronous>, transform_indices = @transform_5, window_bounds = array<i64: 1, 256>}, {transform_indices = @transform_6, window_bounds = array<i64: 1, 1>}, {transform_indices = @transform_7, window_bounds = array<i64: 128, 1>}]} {
    %c0 = arith.constant 0 : index
    %c0_0 = arith.constant 0 : index
    %0 = vector.load %arg1[%c0, %c0_0] : memref<128x128xf32, #tpu.memory_space<vmem>>, vector<128x128xf32>
    %c0_1 = arith.constant 0 : index
    %c0_2 = arith.constant 0 : index
    %1 = vector.load %arg3[%c0_1, %c0_2] : memref<128x256xf32, #tpu.memory_space<vmem>>, vector<128x256xf32>
    %cst = arith.constant dense<0.000000e+00> : vector<128x256xf32>
    %2 = tpu.matmul %0, %1, %cst {dimension_numbers = #tpu.dot_dimension_numbers<[1], [0], [0], [1], [0, 0, 1, 1], [], []>} : vector<128x128xf32>, vector<128x256xf32>, vector<128x256xf32> -> vector<128x256xf32>
    %c0_3 = arith.constant 0 : index
    %c0_4 = arith.constant 0 : index
    %3 = vector.load %arg2[%c0_3, %c0_4] : memref<128x128xf32, #tpu.memory_space<vmem>>, vector<128x128xf32>
    %c0_5 = arith.constant 0 : index
    %c0_6 = arith.constant 0 : index
    %4 = vector.load %arg4[%c0_5, %c0_6] : memref<128x256xf32, #tpu.memory_space<vmem>>, vector<128x256xf32>
    %cst_7 = arith.constant dense<0.000000e+00> : vector<128x256xf32>
    %5 = tpu.matmul %3, %4, %cst_7 {dimension_numbers = #tpu.dot_dimension_numbers<[1], [0], [0], [1], [0, 0, 1, 1], [], []>} : vector<128x128xf32>, vector<128x256xf32>, vector<128x256xf32> -> vector<128x256xf32>
    %6 = arith.addf %2, %5 : vector<128x256xf32>
    %c0_8 = arith.constant 0 : index
    %c0_9 = arith.constant 0 : index
    %7 = vector.load %arg5[%c0_8, %c0_9] : memref<1x256xf32, #tpu.memory_space<vmem>>, vector<1x256xf32>
    %8 = vector.broadcast %7 : vector<1x256xf32> to vector<128x256xf32>
    %9 = arith.addf %6, %8 : vector<128x256xf32>
    %cst_10 = arith.constant 0.000000e+00 : f32
    %10 = vector.broadcast %cst_10 : f32 to vector<128x256xf32>
    %11 = arith.maximumf %9, %10 : vector<128x256xf32>
    %c0_11 = arith.constant 0 : index
    %c0_12 = arith.constant 0 : index
    %12 = vector.load %arg6[%c0_11, %c0_12] : memref<1x256xf32, #tpu.memory_space<vmem>>, vector<1x256xf32>
    %13 = vector.broadcast %12 : vector<1x256xf32> to vector<128x256xf32>
    %14 = arith.mulf %11, %13 : vector<128x256xf32>
    %cst_13 = arith.constant dense<0.000000e+00> : vector<128xf32>
    %15 = vector.multi_reduction <add>, %14, %cst_13 [1] : vector<128x256xf32> to vector<128xf32>
    %16 = vector.shape_cast %15 : vector<128xf32> to vector<128x1xf32>
    %c0_14 = arith.constant 0 : index
    %c0_15 = arith.constant 0 : index
    %17 = memref.load %arg7[%c0_14, %c0_15] : memref<1x1xf32, #tpu.memory_space<smem>>
    %18 = vector.broadcast %17 : f32 to vector<128x1xf32>
    %19 = arith.addf %16, %18 : vector<128x1xf32>
    %c0_16 = arith.constant 0 : index
    %c0_17 = arith.constant 0 : index
    %20 = vector.load %arg8[%c0_16, %c0_17] : memref<128x1xf32, #tpu.memory_space<vmem>>, vector<128x1xf32>
    tpu.vector_store %arg8[%c0_16, %c0_17], %19 {strides = array<i32>} : memref<128x1xf32, #tpu.memory_space<vmem>>, vector<128x1xf32>,
    return
  }
  func.func @transform_0(%arg0: i32) -> (i32, i32) {
    %c0_i32 = arith.constant 0 : i32
    %c0_i32_0 = arith.constant 0 : i32
    return %arg0, %c0_i32 : i32, i32
  }
  func.func @transform_1(%arg0: i32) -> (i32, i32) {
    %c0_i32 = arith.constant 0 : i32
    %c0_i32_0 = arith.constant 0 : i32
    return %arg0, %c0_i32 : i32, i32
  }
  func.func @transform_2(%arg0: i32) -> (i32, i32) {
    %c0_i32 = arith.constant 0 : i32
    %c0_i32_0 = arith.constant 0 : i32
    %c0_i32_1 = arith.constant 0 : i32
    return %c0_i32, %c0_i32_0 : i32, i32
  }
  func.func @transform_3(%arg0: i32) -> (i32, i32) {
    %c0_i32 = arith.constant 0 : i32
    %c0_i32_0 = arith.constant 0 : i32
    %c0_i32_1 = arith.constant 0 : i32
    return %c0_i32, %c0_i32_0 : i32, i32
  }
  func.func @transform_4(%arg0: i32) -> (i32, i32) {
    %c0_i32 = arith.constant 0 : i32
    %c0_i32_0 = arith.constant 0 : i32
    %c0_i32_1 = arith.constant 0 : i32
    return %c0_i32, %c0_i32_0 : i32, i32
  }
  func.func @transform_5(%arg0: i32) -> (i32, i32) {
    %c0_i32 = arith.constant 0 : i32
    %c0_i32_0 = arith.constant 0 : i32
    %c0_i32_1 = arith.constant 0 : i32
    return %c0_i32, %c0_i32_0 : i32, i32
  }
  func.func @transform_6(%arg0: i32) -> (i32, i32) {
    %c0_i32 = arith.constant 0 : i32
    %c0_i32_0 = arith.constant 0 : i32
    %c0_i32_1 = arith.constant 0 : i32
    return %c0_i32, %c0_i32_0 : i32, i32
  }
  func.func @transform_7(%arg0: i32) -> (i32, i32) {
    %c0_i32 = arith.constant 0 : i32
    %c0_i32_0 = arith.constant 0 : i32
    return %arg0, %c0_i32 : i32, i32
  }
}

</mosaic_0001>

<bundles_post_ra>
// kernel: integrated_citation_model_forward.4
= control target key start
LH: loop header
LB: loop body
LE: loop exit
PB: predicated region body
PF: predicated region fallthrough
CT: control target
= control target key end

     0   :  { %s542_s1 = inlined_call_operand.vmem [shape: f32[128,128], index: 1, kind: input, shape index: {}]   ;;  %s543_s0 = inlined_call_operand.vmem [shape: f32[128,128], index: 0, kind: input, shape index: {}]   ;;  %s544_s2 = inlined_call_operand.vmem [shape: f32[128,128], index: 2, kind: input, shape index: {}]   ;;  %s545_s3 = inlined_call_operand.vmem [shape: f32[128,128], index: 3, kind: output, shape index: {}]  }
   0x1   :  { %v97_v0 = vld [vmem:[%s542_s1 + $0x78] sm:$0xff]  ;;  %v96_v1 = vld [vmem:[%s542_s1 + $0x70] sm:$0xff]  ;;  %v95_v2 = vld [vmem:[%s542_s1 + $0x68] sm:$0xff] }
   0x2   :  { %251 = vmatpush.msra.mxu2 %v97_v0  ;;  %252 = vmatpush.msra.mxu3 %v97_v0  ;;  %v94_v3 = vld [vmem:[%s542_s1 + $0x60] sm:$0xff]  ;;  %v93_v4 = vld [vmem:[%s542_s1 + $0x58] sm:$0xff]  ;;  %v92_v5 = vld [vmem:[%s542_s1 + $0x50] sm:$0xff] }
   0x3   :  { %98 = vmatpush.msra.mxu0 %v97_v0  ;;  %250 = vmatpush.msra.mxu1 %v97_v0  ;;  %v91_v6 = vld [vmem:[%s542_s1 + $0x48] sm:$0xff]  ;;  %v90_v7 = vld [vmem:[%s542_s1 + $0x40] sm:$0xff]  ;;  %v89_v8 = vld [vmem:[%s542_s1 + $0x38] sm:$0xff] }
   0x4   :  { %254 = vmatpush.msra.mxu2 %v96_v1  ;;  %255 = vmatpush.msra.mxu3 %v96_v1  ;;  %v88_v9 = vld [vmem:[%s542_s1 + $0x30] sm:$0xff]  ;;  %v87_v10 = vld [vmem:[%s542_s1 + $0x28] sm:$0xff]  ;;  %v86_v11 = vld [vmem:[%s542_s1 + $0x20] sm:$0xff] }
   0x5   :  { %99 = vmatpush.msra.mxu0 %v96_v1  ;;  %253 = vmatpush.msra.mxu1 %v96_v1  ;;  %v85_v12 = vld [vmem:[%s542_s1 + $0x18] sm:$0xff]  ;;  %v84_v13 = vld [vmem:[%s542_s1 + $0x10] sm:$0xff]  ;;  %v83_v14 = vld [vmem:[%s542_s1 + $0x8] sm:$0xff] }
   0x6   :  { %257 = vmatpush.msra.mxu2 %v95_v2  ;;  %258 = vmatpush.msra.mxu3 %v95_v2  ;;  %v82_v15 = vld [vmem:[%s542_s1] sm:$0xff]  ;;  %v75_v20 = vld [vmem:[%s543_s0 + $0x48] sm:$0xff]  ;;  %v76_v24 = vld [vmem:[%s543_s0 + $0x50] sm:$0xff] }
   0x7   :  { %100 = vmatpush.msra.mxu0 %v95_v2  ;;  %256 = vmatpush.msra.mxu1 %v95_v2  ;;  %v74_v16 = vld [vmem:[%s543_s0 + $0x40] sm:$0xff]  ;;  %v79_v21 = vld [vmem:[%s543_s0 + $0x68] sm:$0xff]  ;;  %v80_v25 = vld [vmem:[%s543_s0 + $0x70] sm:$0xff] }
   0x8   :  { %260 = vmatpush.msra.mxu2 %v94_v3  ;;  %261 = vmatpush.msra.mxu3 %v94_v3  ;;  %v78_v17 = vld [vmem:[%s543_s0 + $0x60] sm:$0xff]  ;;  %v67_v22 = vld [vmem:[%s543_s0 + $0x8] sm:$0xff]  ;;  %v68_v26 = vld [vmem:[%s543_s0 + $0x10] sm:$0xff] }
   0x9   :  { %101 = vmatpush.msra.mxu0 %v94_v3  ;;  %259 = vmatpush.msra.mxu1 %v94_v3  ;;  %v66_v18 = vld [vmem:[%s543_s0] sm:$0xff]  ;;  %v71_v23 = vld [vmem:[%s543_s0 + $0x28] sm:$0xff]  ;;  %v72_v27 = vld [vmem:[%s543_s0 + $0x30] sm:$0xff] }
   0xa   :  { %263 = vmatpush.msra.mxu2 %v93_v4  ;;  %264 = vmatpush.msra.mxu3 %v93_v4  ;;  %v70_v19 = vld [vmem:[%s543_s0 + $0x20] sm:$0xff]  ;;  %v77_v28 = vld [vmem:[%s543_s0 + $0x58] sm:$0xff]  ;;  %v19_v44 = vld [vmem:[%s544_s2 + $0x8] sm:$0xff] }
   0xb   :  { %102 = vmatpush.msra.mxu0 %v93_v4  ;;  %262 = vmatpush.msra.mxu1 %v93_v4  ;;  %v81_v29 = vld [vmem:[%s543_s0 + $0x78] sm:$0xff]  ;;  %v18_v32 = vld [vmem:[%s544_s2] sm:$0xff]  ;;  %v23_v45 = vld [vmem:[%s544_s2 + $0x28] sm:$0xff] }
   0xc   :  { %266 = vmatpush.msra.mxu2 %v92_v5  ;;  %267 = vmatpush.msra.mxu3 %v92_v5  ;;  %v69_v30 = vld [vmem:[%s543_s0 + $0x18] sm:$0xff]  ;;  %v22_v33 = vld [vmem:[%s544_s2 + $0x20] sm:$0xff]  ;;  %v27_v52 = vld [vmem:[%s544_s2 + $0x48] sm:$0xff] }
   0xd   :  { %103 = vmatpush.msra.mxu0 %v92_v5  ;;  %265 = vmatpush.msra.mxu1 %v92_v5  ;;  %v73_v31 = vld [vmem:[%s543_s0 + $0x38] sm:$0xff]  ;;  %v26_v38 = vld [vmem:[%s544_s2 + $0x40] sm:$0xff]  ;;  %v31_v53 = vld [vmem:[%s544_s2 + $0x68] sm:$0xff] }
   0xe   :  { %269 = vmatpush.msra.mxu2 %v91_v6  ;;  %270 = vmatpush.msra.mxu3 %v91_v6  ;;  %v30_v39 = vld [vmem:[%s544_s2 + $0x60] sm:$0xff]  ;;  %v20_v60 = vld [vmem:[%s544_s2 + $0x10] sm:$0xff] }
   0xf   :  { %104 = vmatpush.msra.mxu0 %v91_v6  ;;  %268 = vmatpush.msra.mxu1 %v91_v6  ;;  %v24_v61 = vld [vmem:[%s544_s2 + $0x30] sm:$0xff] }
  0x10   :  { %272 = vmatpush.msra.mxu2 %v90_v7  ;;  %273 = vmatpush.msra.mxu3 %v90_v7  ;;  %v28_v4 = vld [vmem:[%s544_s2 + $0x50] sm:$0xff] }
  0x11   :  { %105 = vmatpush.msra.mxu0 %v90_v7  ;;  %271 = vmatpush.msra.mxu1 %v90_v7  ;;  %v32_v5 = vld [vmem:[%s544_s2 + $0x70] sm:$0xff] }
  0x12   :  { %275 = vmatpush.msra.mxu2 %v89_v8  ;;  %276 = vmatpush.msra.mxu3 %v89_v8 }
  0x13   :  { %106 = vmatpush.msra.mxu0 %v89_v8  ;;  %274 = vmatpush.msra.mxu1 %v89_v8 }
  0x14   :  { %278 = vmatpush.msra.mxu2 %v88_v9  ;;  %279 = vmatpush.msra.mxu3 %v88_v9 }
  0x15   :  { %107 = vmatpush.msra.mxu0 %v88_v9  ;;  %277 = vmatpush.msra.mxu1 %v88_v9 }
  0x16   :  { %281 = vmatpush.msra.mxu2 %v87_v10  ;;  %282 = vmatpush.msra.mxu3 %v87_v10 }
  0x17   :  { %108 = vmatpush.msra.mxu0 %v87_v10  ;;  %280 = vmatpush.msra.mxu1 %v87_v10 }
  0x18   :  { %284 = vmatpush.msra.mxu2 %v86_v11  ;;  %285 = vmatpush.msra.mxu3 %v86_v11 }
  0x19   :  { %109 = vmatpush.msra.mxu0 %v86_v11  ;;  %283 = vmatpush.msra.mxu1 %v86_v11 }
  0x1a   :  { %287 = vmatpush.msra.mxu2 %v85_v12  ;;  %288 = vmatpush.msra.mxu3 %v85_v12 }
  0x1b   :  { %110 = vmatpush.msra.mxu0 %v85_v12  ;;  %286 = vmatpush.msra.mxu1 %v85_v12  ;;  %v21_v12 = vld [vmem:[%s544_s2 + $0x18] sm:$0xff] }
  0x1c   :  { %290 = vmatpush.msra.mxu2 %v84_v13  ;;  %291 = vmatpush.msra.mxu3 %v84_v13 }
  0x1d   :  { %111 = vmatpush.msra.mxu0 %v84_v13  ;;  %289 = vmatpush.msra.mxu1 %v84_v13  ;;  %v25_v13 = vld [vmem:[%s544_s2 + $0x38] sm:$0xff] }
  0x1e   :  { %293 = vmatpush.msra.mxu2 %v83_v14  ;;  %294 = vmatpush.msra.mxu3 %v83_v14 }
  0x1f   :  { %112 = vmatpush.msra.mxu0 %v83_v14  ;;  %292 = vmatpush.msra.mxu1 %v83_v14 }
  0x20   :  { %296 = vmatpush.msra.mxu2 %v82_v15  ;;  %297 = vmatpush.msra.mxu3 %v82_v15 }
  0x21   :  { %138 = vmatmul.f32.vlgmr.msra.gmra.mxu2 %v74_v16  ;;  %150 = vmatmul.f32.vlgmr.msra.gmra.mxu3 %v78_v17 }
  0x22   :  { %113 = vmatpush.msra.mxu0 %v82_v15  ;;  %295 = vmatpush.msra.mxu1 %v82_v15 }
  0x23   :  { %114 = vmatmul.f32.vlgmr.msra.gmra.mxu0 %v66_v18  ;;  %126 = vmatmul.f32.vlgmr.msra.gmra.mxu1 %v70_v19 }
  0x29   :  { %141 = vmatmul.f32.gmra.mxu2 %v75_v20  ;;  %153 = vmatmul.f32.gmra.mxu3 %v79_v21  ;;  %v29_v20 = vld [vmem:[%s544_s2 + $0x58] sm:$0xff] }
  0x2a   :  { %v33_v21 = vld [vmem:[%s544_s2 + $0x78] sm:$0xff] }
  0x2b   :  { %117 = vmatmul.f32.gmra.mxu0 %v67_v22  ;;  %129 = vmatmul.f32.gmra.mxu1 %v71_v23 }
  0x31   :  { %144 = vmatmul.f32.gmra.mxu2 %v76_v24  ;;  %156 = vmatmul.f32.gmra.mxu3 %v80_v25 }
  0x33   :  { %120 = vmatmul.f32.gmra.mxu0 %v68_v26  ;;  %132 = vmatmul.f32.gmra.mxu1 %v72_v27 }
  0x39   :  { %147 = vmatmul.f32.gmra.mxu2 %v77_v28  ;;  %159 = vmatmul.f32.gmra.mxu3 %v81_v29 }
  0x3b   :  { %123 = vmatmul.f32.gmra.mxu0 %v69_v30  ;;  %135 = vmatmul.f32.gmra.mxu1 %v73_v31 }
  0xa0   :  { %v115_v34 = vpop.f32.mrf.mxu0  ;;  %v127_v35 = vpop.f32.mrf.mxu1 }
  0xa1   :  { %v163_v36 = vadd.f32 %v115_v34, %v18_v32  ;;  %v167_v37 = vadd.f32 %v127_v35, %v22_v33 }
  0xa3   :  { %298 = vtanh.f32 %v163_v36 }
  0xa4   :  { %300 = vtanh.f32 %v167_v37  ;;  %v139_v40 = vpop.f32.mrf.mxu2  ;;  %v151_v41 = vpop.f32.mrf.mxu3 }
  0xa5   :  { %v171_v42 = vadd.f32 %v139_v40, %v26_v38  ;;  %v175_v43 = vadd.f32 %v151_v41, %v30_v39 }
  0xa7   :  { %302 = vtanh.f32 %v171_v42 }
  0xa8   :  { %304 = vtanh.f32 %v175_v43  ;;  %v118_v46 = vpop.f32.mrf.mxu0  ;;  %v130_v47 = vpop.f32.mrf.mxu1 }
  0xa9   :  { %v299_v48 = vpop.eup %298  ;;  %v164_v49 = vadd.f32 %v118_v46, %v19_v44  ;;  %v168_v50 = vadd.f32 %v130_v47, %v23_v45 }
  0xaa   :  { %v301_v51 = vpop.eup %300  ;;  %230 = vst [vmem:[%s545_s3] sm:$0xff] %v299_v48 }
  0xab   :  { %234 = vst [vmem:[%s545_s3 + $0x20] sm:$0xff] %v301_v51  ;;  %306 = vtanh.f32 %v164_v49 }
  0xac   :  { %308 = vtanh.f32 %v168_v50  ;;  %v142_v54 = vpop.f32.mrf.mxu2  ;;  %v154_v55 = vpop.f32.mrf.mxu3 }
  0xad   :  { %v303_v56 = vpop.eup %302  ;;  %v172_v57 = vadd.f32 %v142_v54, %v27_v52  ;;  %v176_v58 = vadd.f32 %v154_v55, %v31_v53 }
  0xae   :  { %v305_v59 = vpop.eup %304  ;;  %238 = vst [vmem:[%s545_s3 + $0x40] sm:$0xff] %v303_v56 }
  0xaf   :  { %242 = vst [vmem:[%s545_s3 + $0x60] sm:$0xff] %v305_v59  ;;  %310 = vtanh.f32 %v172_v57 }
  0xb0   :  { %312 = vtanh.f32 %v176_v58  ;;  %v121_v62 = vpop.f32.mrf.mxu0  ;;  %v133_v63 = vpop.f32.mrf.mxu1 }
  0xb1   :  { %v307_v0 = vpop.eup %306  ;;  %v165_v1 = vadd.f32 %v121_v62, %v20_v60  ;;  %v169_v2 = vadd.f32 %v133_v63, %v24_v61 }
  0xb2   :  { %v309_v3 = vpop.eup %308  ;;  %231 = vst [vmem:[%s545_s3 + $0x8] sm:$0xff] %v307_v0 }
  0xb3   :  { %235 = vst [vmem:[%s545_s3 + $0x28] sm:$0xff] %v309_v3  ;;  %314 = vtanh.f32 %v165_v1 }
  0xb4   :  { %316 = vtanh.f32 %v169_v2  ;;  %v145_v6 = vpop.f32.mrf.mxu2  ;;  %v157_v7 = vpop.f32.mrf.mxu3 }
  0xb5   :  { %v311_v8 = vpop.eup %310  ;;  %v173_v9 = vadd.f32 %v145_v6, %v28_v4  ;;  %v177_v10 = vadd.f32 %v157_v7, %v32_v5 }
  0xb6   :  { %v313_v11 = vpop.eup %312  ;;  %239 = vst [vmem:[%s545_s3 + $0x48] sm:$0xff] %v311_v8 }
  0xb7   :  { %243 = vst [vmem:[%s545_s3 + $0x68] sm:$0xff] %v313_v11  ;;  %318 = vtanh.f32 %v173_v9 }
  0xb8   :  { %320 = vtanh.f32 %v177_v10  ;;  %v124_v14 = vpop.f32.mrf.mxu0  ;;  %v136_v15 = vpop.f32.mrf.mxu1 }
  0xb9   :  { %v315_v16 = vpop.eup %314  ;;  %v166_v17 = vadd.f32 %v124_v14, %v21_v12  ;;  %v170_v18 = vadd.f32 %v136_v15, %v25_v13 }
  0xba   :  { %v317_v19 = vpop.eup %316  ;;  %232 = vst [vmem:[%s545_s3 + $0x10] sm:$0xff] %v315_v16 }
  0xbb   :  { %236 = vst [vmem:[%s545_s3 + $0x30] sm:$0xff] %v317_v19  ;;  %322 = vtanh.f32 %v166_v17 }
  0xbc   :  { %324 = vtanh.f32 %v170_v18  ;;  %v148_v22 = vpop.f32.mrf.mxu2  ;;  %v160_v23 = vpop.f32.mrf.mxu3 }
  0xbd   :  { %v319_v24 = vpop.eup %318  ;;  %v174_v25 = vadd.f32 %v148_v22, %v29_v20  ;;  %v178_v26 = vadd.f32 %v160_v23, %v33_v21 }
  0xbe   :  { %v321_v27 = vpop.eup %320  ;;  %240 = vst [vmem:[%s545_s3 + $0x50] sm:$0xff] %v319_v24 }
  0xbf   :  { %244 = vst [vmem:[%s545_s3 + $0x70] sm:$0xff] %v321_v27  ;;  %326 = vtanh.f32 %v174_v25 }
  0xc0   :  { %328 = vtanh.f32 %v178_v26 }
  0xc1   :  { %v323_v28 = vpop.eup %322 }
  0xc2   :  { %v325_v29 = vpop.eup %324  ;;  %233 = vst [vmem:[%s545_s3 + $0x18] sm:$0xff] %v323_v28 }
  0xc3   :  { %237 = vst [vmem:[%s545_s3 + $0x38] sm:$0xff] %v325_v29 }
  0xc5   :  { %v327_v30 = vpop.eup %326 }
  0xc6   :  { %v329_v31 = vpop.eup %328  ;;  %241 = vst [vmem:[%s545_s3 + $0x58] sm:$0xff] %v327_v30 }
  0xc7   :  { %245 = vst [vmem:[%s545_s3 + $0x78] sm:$0xff] %v329_v31 }

// kernel: integrated_citation_model_forward.3
= control target key start
LH: loop header
LB: loop body
LE: loop exit
PB: predicated region body
PF: predicated region fallthrough
CT: control target
= control target key end

     0   :  { %vm47_vm0 = vcmask 523264   ;;  %s598_s1 = inlined_call_operand.vmem [shape: f32[64,128], index: 1, kind: input, shape index: {}]   ;;  %s599_s2 = inlined_call_operand.vmem [shape: f32[64,128], index: 2, kind: input, shape index: {}]   ;;  %s600_s3 = inlined_call_operand.vmem [shape: f32[1,128], index: 3, kind: input, shape index: {}]   ;;  %s601_s0 = inlined_call_operand.vmem [shape: f32[128,64], index: 0, kind: input, shape index: {}]   ;;  %s602_s5 = inlined_call_operand.vmem [shape: f32[128,128], index: 5, kind: output, shape index: {1}]   ;;  %s603_s4 = inlined_call_operand.vmem [shape: f32[128,128], index: 4, kind: output, shape index: {0}]  }
   0x1   :  { %v42_v0 = vld [vmem:[%s598_s1 + $0x38] sm:$0xff]  ;;  %v41_v1 = vld [vmem:[%s598_s1 + $0x30] sm:$0xff]  ;;  %v40_v4 = vld [vmem:[%s598_s1 + $0x28] sm:$0xff] }
   0x2   :  { %v184_v2 = vld [vmem:[%s599_s2 + $0x38] sm:$0xff]  ;;  %306 = vmatpush.msra.mxu2 %v42_v0  ;;  %v183_v3 = vld [vmem:[%s599_s2 + $0x30] sm:$0xff]  ;;  %104 = vmatpush.msra.mxu0 %v42_v0  ;;  %v182_v5 = vld [vmem:[%s599_s2 + $0x28] sm:$0xff] }
   0x3   :  { %314 = vmatpush.msra.mxu3 %v184_v2  ;;  %193 = vmatpush.msra.mxu1 %v184_v2  ;;  %v39_v6 = vld [vmem:[%s598_s1 + $0x20] sm:$0xff]  ;;  %v38_v8 = vld [vmem:[%s598_s1 + $0x18] sm:$0xff]  ;;  %v37_v10 = vld [vmem:[%s598_s1 + $0x10] sm:$0xff] }
   0x4   :  { %307 = vmatpush.msra.mxu2 %v41_v1  ;;  %105 = vmatpush.msra.mxu0 %v41_v1  ;;  %v181_v7 = vld [vmem:[%s599_s2 + $0x20] sm:$0xff]  ;;  %v180_v9 = vld [vmem:[%s599_s2 + $0x18] sm:$0xff]  ;;  %v179_v11 = vld [vmem:[%s599_s2 + $0x10] sm:$0xff] }
   0x5   :  { %315 = vmatpush.msra.mxu3 %v183_v3  ;;  %194 = vmatpush.msra.mxu1 %v183_v3  ;;  %v36_v12 = vld [vmem:[%s598_s1 + $0x8] sm:$0xff]  ;;  %v35_v14 = vld [vmem:[%s598_s1] sm:$0xff]  ;;  %v29_v20 = vld [vmem:[%s601_s0 + $0x50] sm:$0xff] }
   0x6   :  { %308 = vmatpush.msra.mxu2 %v40_v4  ;;  %106 = vmatpush.msra.mxu0 %v40_v4  ;;  %v178_v13 = vld [vmem:[%s599_s2 + $0x8] sm:$0xff]  ;;  %v177_v15 = vld [vmem:[%s599_s2] sm:$0xff]  ;;  %v21_v21 = vld [vmem:[%s601_s0 + $0x10] sm:$0xff] }
   0x7   :  { %316 = vmatpush.msra.mxu3 %v182_v5  ;;  %195 = vmatpush.msra.mxu1 %v182_v5  ;;  %v27_v16 = vld [vmem:[%s601_s0 + $0x40] sm:$0xff]  ;;  %v28_v18 = vld [vmem:[%s601_s0 + $0x48] sm:$0xff]  ;;  %v30_v22 = vld [vmem:[%s601_s0 + $0x58] sm:$0xff] }
   0x8   :  { %309 = vmatpush.msra.mxu2 %v39_v6  ;;  %107 = vmatpush.msra.mxu0 %v39_v6  ;;  %v19_v17 = vld [vmem:[%s601_s0] sm:$0xff]  ;;  %v20_v19 = vld [vmem:[%s601_s0 + $0x8] sm:$0xff]  ;;  %v22_v23 = vld [vmem:[%s601_s0 + $0x18] sm:$0xff] }
   0x9   :  { %317 = vmatpush.msra.mxu3 %v181_v7  ;;  %196 = vmatpush.msra.mxu1 %v181_v7  ;;  %v31_v24 = vld [vmem:[%s601_s0 + $0x60] sm:$0xff]  ;;  %v32_v26 = vld [vmem:[%s601_s0 + $0x68] sm:$0xff]  ;;  %v33_v28 = vld [vmem:[%s601_s0 + $0x70] sm:$0xff] }
   0xa   :  { %310 = vmatpush.msra.mxu2 %v38_v8  ;;  %108 = vmatpush.msra.mxu0 %v38_v8  ;;  %v23_v25 = vld [vmem:[%s601_s0 + $0x20] sm:$0xff]  ;;  %v24_v27 = vld [vmem:[%s601_s0 + $0x28] sm:$0xff]  ;;  %v25_v29 = vld [vmem:[%s601_s0 + $0x30] sm:$0xff] }
   0xb   :  { %318 = vmatpush.msra.mxu3 %v180_v9  ;;  %197 = vmatpush.msra.mxu1 %v180_v9  ;;  %v34_v30 = vld [vmem:[%s601_s0 + $0x78] sm:$0xff]  ;;  %v484_v32 = vld [vmem:[%s600_s3] ss:$0 sm:$0xff] }
   0xc   :  { %311 = vmatpush.msra.mxu2 %v37_v10  ;;  %109 = vmatpush.msra.mxu0 %v37_v10  ;;  %v26_v31 = vld [vmem:[%s601_s0 + $0x38] sm:$0xff] }
   0xd   :  { %319 = vmatpush.msra.mxu3 %v179_v11  ;;  %198 = vmatpush.msra.mxu1 %v179_v11 }
   0xe   :  { %312 = vmatpush.msra.mxu2 %v36_v12  ;;  %110 = vmatpush.msra.mxu0 %v36_v12 }
   0xf   :  { %320 = vmatpush.msra.mxu3 %v178_v13  ;;  %199 = vmatpush.msra.mxu1 %v178_v13 }
  0x10   :  { %313 = vmatpush.msra.mxu2 %v35_v14  ;;  %111 = vmatpush.msra.mxu0 %v35_v14 }
  0x11   :  { %321 = vmatpush.msra.mxu3 %v177_v15  ;;  %282 = vmatmul.msk.f32.vlgmr.msra.gmra.mxu2 %vm47_vm0, %v27_v16 }
  0x12   :  { %298 = vmatmul.msk.f32.vlgmr.msra.gmra.mxu3 %vm47_vm0, %v27_v16  ;;  %200 = vmatpush.msra.mxu1 %v177_v15 }
  0x13   :  { %274 = vmatmul.msk.f32.vlgmr.msra.gmra.mxu0 %vm47_vm0, %v19_v17  ;;  %290 = vmatmul.msk.f32.vlgmr.msra.gmra.mxu1 %vm47_vm0, %v19_v17 }
  0x19   :  { %283 = vmatmul.msk.f32.gmra.mxu2 %vm47_vm0, %v28_v18 }
  0x1a   :  { %299 = vmatmul.msk.f32.gmra.mxu3 %vm47_vm0, %v28_v18 }
  0x1b   :  { %275 = vmatmul.msk.f32.gmra.mxu0 %vm47_vm0, %v20_v19  ;;  %291 = vmatmul.msk.f32.gmra.mxu1 %vm47_vm0, %v20_v19 }
  0x21   :  { %284 = vmatmul.msk.f32.gmra.mxu2 %vm47_vm0, %v29_v20 }
  0x22   :  { %300 = vmatmul.msk.f32.gmra.mxu3 %vm47_vm0, %v29_v20 }
  0x23   :  { %276 = vmatmul.msk.f32.gmra.mxu0 %vm47_vm0, %v21_v21  ;;  %292 = vmatmul.msk.f32.gmra.mxu1 %vm47_vm0, %v21_v21 }
  0x29   :  { %285 = vmatmul.msk.f32.gmra.mxu2 %vm47_vm0, %v30_v22 }
  0x2a   :  { %301 = vmatmul.msk.f32.gmra.mxu3 %vm47_vm0, %v30_v22 }
  0x2b   :  { %277 = vmatmul.msk.f32.gmra.mxu0 %vm47_vm0, %v22_v23  ;;  %293 = vmatmul.msk.f32.gmra.mxu1 %vm47_vm0, %v22_v23 }
  0x31   :  { %286 = vmatmul.msk.f32.gmra.mxu2 %vm47_vm0, %v31_v24 }
  0x32   :  { %302 = vmatmul.msk.f32.gmra.mxu3 %vm47_vm0, %v31_v24 }
  0x33   :  { %278 = vmatmul.msk.f32.gmra.mxu0 %vm47_vm0, %v23_v25  ;;  %294 = vmatmul.msk.f32.gmra.mxu1 %vm47_vm0, %v23_v25 }
  0x39   :  { %287 = vmatmul.msk.f32.gmra.mxu2 %vm47_vm0, %v32_v26 }
  0x3a   :  { %303 = vmatmul.msk.f32.gmra.mxu3 %vm47_vm0, %v32_v26 }
  0x3b   :  { %279 = vmatmul.msk.f32.gmra.mxu0 %vm47_vm0, %v24_v27  ;;  %295 = vmatmul.msk.f32.gmra.mxu1 %vm47_vm0, %v24_v27 }
  0x41   :  { %288 = vmatmul.msk.f32.gmra.mxu2 %vm47_vm0, %v33_v28 }
  0x42   :  { %304 = vmatmul.msk.f32.gmra.mxu3 %vm47_vm0, %v33_v28 }
  0x43   :  { %280 = vmatmul.msk.f32.gmra.mxu0 %vm47_vm0, %v25_v29  ;;  %296 = vmatmul.msk.f32.gmra.mxu1 %vm47_vm0, %v25_v29 }
  0x49   :  { %289 = vmatmul.msk.f32.gmra.mxu2 %vm47_vm0, %v34_v30 }
  0x4a   :  { %305 = vmatmul.msk.f32.gmra.mxu3 %vm47_vm0, %v34_v30 }
  0x4b   :  { %281 = vmatmul.msk.f32.gmra.mxu0 %vm47_vm0, %v26_v31  ;;  %297 = vmatmul.msk.f32.gmra.mxu1 %vm47_vm0, %v26_v31 }
  0x90   :  { %v113_v33 = vpop.f32.mrf.mxu0  ;;  %v202_v34 = vpop.f32.mrf.mxu1 }
  0x91   :  { %v114_v35 = vadd.f32 %v484_v32, %v113_v33  ;;  %250 = vst [vmem:[%s602_s5] sm:$0xff] %v202_v34 }
  0x93   :  { %161 = vst [vmem:[%s603_s4] sm:$0xff] %v114_v35 }
  0x94   :  { %v137_v36 = vpop.f32.mrf.mxu2 }
  0x95   :  { %v226_v37 = vpop.f32.mrf.mxu3  ;;  %v138_v38 = vadd.f32 %v484_v32, %v137_v36 }
  0x96   :  { %258 = vst [vmem:[%s602_s5 + $0x40] sm:$0xff] %v226_v37 }
  0x97   :  { %169 = vst [vmem:[%s603_s4 + $0x40] sm:$0xff] %v138_v38 }
  0x98   :  { %v116_v39 = vpop.f32.mrf.mxu0  ;;  %v205_v40 = vpop.f32.mrf.mxu1 }
  0x99   :  { %v117_v41 = vadd.f32 %v484_v32, %v116_v39  ;;  %251 = vst [vmem:[%s602_s5 + $0x8] sm:$0xff] %v205_v40 }
  0x9b   :  { %162 = vst [vmem:[%s603_s4 + $0x8] sm:$0xff] %v117_v41 }
  0x9c   :  { %v140_v42 = vpop.f32.mrf.mxu2 }
  0x9d   :  { %v229_v43 = vpop.f32.mrf.mxu3  ;;  %v141_v44 = vadd.f32 %v484_v32, %v140_v42 }
  0x9e   :  { %259 = vst [vmem:[%s602_s5 + $0x48] sm:$0xff] %v229_v43 }
  0x9f   :  { %170 = vst [vmem:[%s603_s4 + $0x48] sm:$0xff] %v141_v44 }
  0xa0   :  { %v119_v45 = vpop.f32.mrf.mxu0  ;;  %v208_v46 = vpop.f32.mrf.mxu1 }
  0xa1   :  { %v120_v47 = vadd.f32 %v484_v32, %v119_v45  ;;  %252 = vst [vmem:[%s602_s5 + $0x10] sm:$0xff] %v208_v46 }
  0xa3   :  { %163 = vst [vmem:[%s603_s4 + $0x10] sm:$0xff] %v120_v47 }
  0xa4   :  { %v143_v48 = vpop.f32.mrf.mxu2 }
  0xa5   :  { %v232_v49 = vpop.f32.mrf.mxu3  ;;  %v144_v50 = vadd.f32 %v484_v32, %v143_v48 }
  0xa6   :  { %260 = vst [vmem:[%s602_s5 + $0x50] sm:$0xff] %v232_v49 }
  0xa7   :  { %171 = vst [vmem:[%s603_s4 + $0x50] sm:$0xff] %v144_v50 }
  0xa8   :  { %v122_v51 = vpop.f32.mrf.mxu0  ;;  %v211_v52 = vpop.f32.mrf.mxu1 }
  0xa9   :  { %v123_v53 = vadd.f32 %v484_v32, %v122_v51  ;;  %253 = vst [vmem:[%s602_s5 + $0x18] sm:$0xff] %v211_v52 }
  0xab   :  { %164 = vst [vmem:[%s603_s4 + $0x18] sm:$0xff] %v123_v53 }
  0xac   :  { %v146_v54 = vpop.f32.mrf.mxu2 }
  0xad   :  { %v235_v55 = vpop.f32.mrf.mxu3  ;;  %v147_v56 = vadd.f32 %v484_v32, %v146_v54 }
  0xae   :  { %261 = vst [vmem:[%s602_s5 + $0x58] sm:$0xff] %v235_v55 }
  0xaf   :  { %172 = vst [vmem:[%s603_s4 + $0x58] sm:$0xff] %v147_v56 }
  0xb0   :  { %v125_v57 = vpop.f32.mrf.mxu0  ;;  %v214_v58 = vpop.f32.mrf.mxu1 }
  0xb1   :  { %v126_v59 = vadd.f32 %v484_v32, %v125_v57  ;;  %254 = vst [vmem:[%s602_s5 + $0x20] sm:$0xff] %v214_v58 }
  0xb3   :  { %165 = vst [vmem:[%s603_s4 + $0x20] sm:$0xff] %v126_v59 }
  0xb4   :  { %v149_v60 = vpop.f32.mrf.mxu2 }
  0xb5   :  { %v238_v61 = vpop.f32.mrf.mxu3  ;;  %v150_v62 = vadd.f32 %v484_v32, %v149_v60 }
  0xb6   :  { %262 = vst [vmem:[%s602_s5 + $0x60] sm:$0xff] %v238_v61 }
  0xb7   :  { %173 = vst [vmem:[%s603_s4 + $0x60] sm:$0xff] %v150_v62 }
  0xb8   :  { %v128_v63 = vpop.f32.mrf.mxu0  ;;  %v217_v0 = vpop.f32.mrf.mxu1 }
  0xb9   :  { %v129_v1 = vadd.f32 %v484_v32, %v128_v63  ;;  %255 = vst [vmem:[%s602_s5 + $0x28] sm:$0xff] %v217_v0 }
  0xbb   :  { %166 = vst [vmem:[%s603_s4 + $0x28] sm:$0xff] %v129_v1 }
  0xbc   :  { %v152_v2 = vpop.f32.mrf.mxu2 }
  0xbd   :  { %v241_v3 = vpop.f32.mrf.mxu3  ;;  %v153_v4 = vadd.f32 %v484_v32, %v152_v2 }
  0xbe   :  { %263 = vst [vmem:[%s602_s5 + $0x68] sm:$0xff] %v241_v3 }
  0xbf   :  { %174 = vst [vmem:[%s603_s4 + $0x68] sm:$0xff] %v153_v4 }
  0xc0   :  { %v131_v5 = vpop.f32.mrf.mxu0  ;;  %v220_v6 = vpop.f32.mrf.mxu1 }
  0xc1   :  { %v132_v7 = vadd.f32 %v484_v32, %v131_v5  ;;  %256 = vst [vmem:[%s602_s5 + $0x30] sm:$0xff] %v220_v6 }
  0xc3   :  { %167 = vst [vmem:[%s603_s4 + $0x30] sm:$0xff] %v132_v7 }
  0xc4   :  { %v155_v8 = vpop.f32.mrf.mxu2 }
  0xc5   :  { %v244_v9 = vpop.f32.mrf.mxu3  ;;  %v156_v10 = vadd.f32 %v484_v32, %v155_v8 }
  0xc6   :  { %264 = vst [vmem:[%s602_s5 + $0x70] sm:$0xff] %v244_v9 }
  0xc7   :  { %175 = vst [vmem:[%s603_s4 + $0x70] sm:$0xff] %v156_v10 }
  0xc8   :  { %v134_v11 = vpop.f32.mrf.mxu0  ;;  %v223_v12 = vpop.f32.mrf.mxu1 }
  0xc9   :  { %v135_v13 = vadd.f32 %v484_v32, %v134_v11  ;;  %257 = vst [vmem:[%s602_s5 + $0x38] sm:$0xff] %v223_v12 }
  0xcb   :  { %168 = vst [vmem:[%s603_s4 + $0x38] sm:$0xff] %v135_v13 }
  0xcc   :  { %v158_v14 = vpop.f32.mrf.mxu2 }
  0xcd   :  { %v247_v15 = vpop.f32.mrf.mxu3  ;;  %v159_v16 = vadd.f32 %v484_v32, %v158_v14 }
  0xce   :  { %265 = vst [vmem:[%s602_s5 + $0x78] sm:$0xff] %v247_v15 }
  0xcf   :  { %176 = vst [vmem:[%s603_s4 + $0x78] sm:$0xff] %v159_v16 }

// kernel: integrated_citation_model_forward.5
= control target key start
LH: loop header
LB: loop body
LE: loop exit
PB: predicated region body
PF: predicated region fallthrough
CT: control target
= control target key end

     0   :  { %vm557_vm0 = vcmask 7168   ;;  %s1051_s2 = inlined_call_operand.vmem [shape: f32[128,256], index: 2, kind: input, shape index: {}]   ;;  %s1052_s3 = inlined_call_operand.vmem [shape: f32[128,256], index: 3, kind: input, shape index: {}]   ;;  %s1053_s0 = inlined_call_operand.vmem [shape: f32[128,128], index: 0, kind: input, shape index: {}]   ;;  %s1054_s1 = inlined_call_operand.vmem [shape: f32[128,128], index: 1, kind: input, shape index: {}]   ;;  %s1055_s4 = inlined_call_operand.vmem [shape: f32[1,256], index: 4, kind: input, shape index: {}]   ;;  %s1056_s5 = inlined_call_operand.vmem [shape: f32[1,256], index: 5, kind: input, shape index: {}]   ;;  %s1057_s6 = inlined_call_operand.<no memory space> [shape: f32[1,1], index: 6, kind: input, shape index: {}]   ;;  %s1058_s7 = inlined_call_operand.vmem [shape: f32[128,1], index: 7, kind: output, shape index: {}]  }
   0x1   :  { %v73_v0 = vld [vmem:[%s1051_s2 + $0xf0] sm:$0xff]  ;;  %v74_v1 = vld [vmem:[%s1051_s2 + $0xf8] sm:$0xff]  ;;  %v71_v2 = vld [vmem:[%s1051_s2 + $0xe0] sm:$0xff] }
   0x2   :  { %253 = vmatpush.msra.mxu2 %v73_v0  ;;  %318 = vmatpush.msra.mxu3 %v74_v1  ;;  %v72_v3 = vld [vmem:[%s1051_s2 + $0xe8] sm:$0xff]  ;;  %v69_v4 = vld [vmem:[%s1051_s2 + $0xd0] sm:$0xff]  ;;  %v70_v5 = vld [vmem:[%s1051_s2 + $0xd8] sm:$0xff] }
   0x3   :  { %v121_v6 = vld [vmem:[%s1052_s3 + $0xf0] sm:$0xff]  ;;  %v122_v7 = vld [vmem:[%s1052_s3 + $0xf8] sm:$0xff]  ;;  %v119_v8 = vld [vmem:[%s1052_s3 + $0xe0] sm:$0xff] }
   0x4   :  { %254 = vmatpush.msra.mxu2 %v71_v2  ;;  %319 = vmatpush.msra.mxu3 %v72_v3  ;;  %v120_v9 = vld [vmem:[%s1052_s3 + $0xe8] sm:$0xff]  ;;  %v67_v10 = vld [vmem:[%s1051_s2 + $0xc0] sm:$0xff]  ;;  %v117_v12 = vld [vmem:[%s1052_s3 + $0xd0] sm:$0xff] }
   0x5   :  { %123 = vmatpush.msra.mxu0 %v121_v6  ;;  %188 = vmatpush.msra.mxu1 %v122_v7  ;;  %v68_v11 = vld [vmem:[%s1051_s2 + $0xc8] sm:$0xff]  ;;  %v118_v13 = vld [vmem:[%s1052_s3 + $0xd8] sm:$0xff]  ;;  %v65_v14 = vld [vmem:[%s1051_s2 + $0xb0] sm:$0xff] }
   0x6   :  { %255 = vmatpush.msra.mxu2 %v69_v4  ;;  %320 = vmatpush.msra.mxu3 %v70_v5  ;;  %v66_v15 = vld [vmem:[%s1051_s2 + $0xb8] sm:$0xff]  ;;  %v115_v16 = vld [vmem:[%s1052_s3 + $0xc0] sm:$0xff]  ;;  %v116_v17 = vld [vmem:[%s1052_s3 + $0xc8] sm:$0xff] }
   0x7   :  { %124 = vmatpush.msra.mxu0 %v119_v8  ;;  %189 = vmatpush.msra.mxu1 %v120_v9  ;;  %v63_v18 = vld [vmem:[%s1051_s2 + $0xa0] sm:$0xff]  ;;  %v64_v19 = vld [vmem:[%s1051_s2 + $0xa8] sm:$0xff]  ;;  %v113_v20 = vld [vmem:[%s1052_s3 + $0xb0] sm:$0xff] }
   0x8   :  { %256 = vmatpush.msra.mxu2 %v67_v10  ;;  %321 = vmatpush.msra.mxu3 %v68_v11  ;;  %v114_v21 = vld [vmem:[%s1052_s3 + $0xb8] sm:$0xff]  ;;  %v61_v22 = vld [vmem:[%s1051_s2 + $0x90] sm:$0xff]  ;;  %v111_v24 = vld [vmem:[%s1052_s3 + $0xa0] sm:$0xff] }
   0x9   :  { %125 = vmatpush.msra.mxu0 %v117_v12  ;;  %190 = vmatpush.msra.mxu1 %v118_v13  ;;  %v62_v23 = vld [vmem:[%s1051_s2 + $0x98] sm:$0xff]  ;;  %v112_v25 = vld [vmem:[%s1052_s3 + $0xa8] sm:$0xff]  ;;  %v59_v26 = vld [vmem:[%s1051_s2 + $0x80] sm:$0xff] }
   0xa   :  { %257 = vmatpush.msra.mxu2 %v65_v14  ;;  %322 = vmatpush.msra.mxu3 %v66_v15  ;;  %v60_v27 = vld [vmem:[%s1051_s2 + $0x88] sm:$0xff]  ;;  %v109_v28 = vld [vmem:[%s1052_s3 + $0x90] sm:$0xff]  ;;  %v110_v29 = vld [vmem:[%s1052_s3 + $0x98] sm:$0xff] }
   0xb   :  { %126 = vmatpush.msra.mxu0 %v115_v16  ;;  %191 = vmatpush.msra.mxu1 %v116_v17  ;;  %v57_v30 = vld [vmem:[%s1051_s2 + $0x70] sm:$0xff]  ;;  %v58_v31 = vld [vmem:[%s1051_s2 + $0x78] sm:$0xff]  ;;  %v107_v32 = vld [vmem:[%s1052_s3 + $0x80] sm:$0xff] }
   0xc   :  { %258 = vmatpush.msra.mxu2 %v63_v18  ;;  %323 = vmatpush.msra.mxu3 %v64_v19  ;;  %v108_v33 = vld [vmem:[%s1052_s3 + $0x88] sm:$0xff]  ;;  %v55_v34 = vld [vmem:[%s1051_s2 + $0x60] sm:$0xff]  ;;  %v105_v36 = vld [vmem:[%s1052_s3 + $0x70] sm:$0xff] }
   0xd   :  { %127 = vmatpush.msra.mxu0 %v113_v20  ;;  %192 = vmatpush.msra.mxu1 %v114_v21  ;;  %v56_v35 = vld [vmem:[%s1051_s2 + $0x68] sm:$0xff]  ;;  %v106_v37 = vld [vmem:[%s1052_s3 + $0x78] sm:$0xff]  ;;  %v53_v38 = vld [vmem:[%s1051_s2 + $0x50] sm:$0xff] }
   0xe   :  { %259 = vmatpush.msra.mxu2 %v61_v22  ;;  %324 = vmatpush.msra.mxu3 %v62_v23  ;;  %v54_v39 = vld [vmem:[%s1051_s2 + $0x58] sm:$0xff]  ;;  %v103_v40 = vld [vmem:[%s1052_s3 + $0x60] sm:$0xff]  ;;  %v104_v41 = vld [vmem:[%s1052_s3 + $0x68] sm:$0xff] }
   0xf   :  { %128 = vmatpush.msra.mxu0 %v111_v24  ;;  %193 = vmatpush.msra.mxu1 %v112_v25  ;;  %v51_v42 = vld [vmem:[%s1051_s2 + $0x40] sm:$0xff]  ;;  %v52_v43 = vld [vmem:[%s1051_s2 + $0x48] sm:$0xff]  ;;  %v101_v44 = vld [vmem:[%s1052_s3 + $0x50] sm:$0xff] }
  0x10   :  { %260 = vmatpush.msra.mxu2 %v59_v26  ;;  %325 = vmatpush.msra.mxu3 %v60_v27  ;;  %v102_v45 = vld [vmem:[%s1052_s3 + $0x58] sm:$0xff]  ;;  %v49_v46 = vld [vmem:[%s1051_s2 + $0x30] sm:$0xff]  ;;  %v99_v48 = vld [vmem:[%s1052_s3 + $0x40] sm:$0xff] }
  0x11   :  { %129 = vmatpush.msra.mxu0 %v109_v28  ;;  %194 = vmatpush.msra.mxu1 %v110_v29  ;;  %v50_v47 = vld [vmem:[%s1051_s2 + $0x38] sm:$0xff]  ;;  %v100_v49 = vld [vmem:[%s1052_s3 + $0x48] sm:$0xff]  ;;  %v47_v50 = vld [vmem:[%s1051_s2 + $0x20] sm:$0xff] }
  0x12   :  { %261 = vmatpush.msra.mxu2 %v57_v30  ;;  %326 = vmatpush.msra.mxu3 %v58_v31  ;;  %v48_v51 = vld [vmem:[%s1051_s2 + $0x28] sm:$0xff]  ;;  %v97_v52 = vld [vmem:[%s1052_s3 + $0x30] sm:$0xff]  ;;  %v98_v53 = vld [vmem:[%s1052_s3 + $0x38] sm:$0xff] }
  0x13   :  { %130 = vmatpush.msra.mxu0 %v107_v32  ;;  %195 = vmatpush.msra.mxu1 %v108_v33  ;;  %v45_v54 = vld [vmem:[%s1051_s2 + $0x10] sm:$0xff]  ;;  %v46_v55 = vld [vmem:[%s1051_s2 + $0x18] sm:$0xff]  ;;  %v95_v56 = vld [vmem:[%s1052_s3 + $0x20] sm:$0xff] }
  0x14   :  { %262 = vmatpush.msra.mxu2 %v55_v34  ;;  %327 = vmatpush.msra.mxu3 %v56_v35  ;;  %v96_v57 = vld [vmem:[%s1052_s3 + $0x28] sm:$0xff]  ;;  %v43_v58 = vld [vmem:[%s1051_s2] sm:$0xff]  ;;  %v93_v61 = vld [vmem:[%s1052_s3 + $0x10] sm:$0xff] }
  0x15   :  { %131 = vmatpush.msra.mxu0 %v105_v36  ;;  %196 = vmatpush.msra.mxu1 %v106_v37  ;;  %v44_v59 = vld [vmem:[%s1051_s2 + $0x8] sm:$0xff]  ;;  %v27_v60 = vld [vmem:[%s1053_s0] sm:$0xff]  ;;  %v94_v62 = vld [vmem:[%s1052_s3 + $0x18] sm:$0xff] }
  0x16   :  { %263 = vmatpush.msra.mxu2 %v53_v38  ;;  %328 = vmatpush.msra.mxu3 %v54_v39  ;;  %v91_v63 = vld [vmem:[%s1052_s3] sm:$0xff]  ;;  %v92_v0 = vld [vmem:[%s1052_s3 + $0x8] sm:$0xff]  ;;  %v29_v4 = vld [vmem:[%s1053_s0 + $0x10] sm:$0xff] }
  0x17   :  { %132 = vmatpush.msra.mxu0 %v103_v40  ;;  %197 = vmatpush.msra.mxu1 %v104_v41  ;;  %v75_v1 = vld [vmem:[%s1054_s1] sm:$0xff]  ;;  %v28_v2 = vld [vmem:[%s1053_s0 + $0x8] sm:$0xff]  ;;  %v77_v5 = vld [vmem:[%s1054_s1 + $0x10] sm:$0xff] }
  0x18   :  { %264 = vmatpush.msra.mxu2 %v51_v42  ;;  %329 = vmatpush.msra.mxu3 %v52_v43  ;;  %v76_v3 = vld [vmem:[%s1054_s1 + $0x8] sm:$0xff]  ;;  %v30_v6 = vld [vmem:[%s1053_s0 + $0x18] sm:$0xff]  ;;  %v31_v8 = vld [vmem:[%s1053_s0 + $0x20] sm:$0xff] }
  0x19   :  { %133 = vmatpush.msra.mxu0 %v101_v44  ;;  %198 = vmatpush.msra.mxu1 %v102_v45  ;;  %v78_v7 = vld [vmem:[%s1054_s1 + $0x18] sm:$0xff]  ;;  %v79_v9 = vld [vmem:[%s1054_s1 + $0x20] sm:$0xff]  ;;  %v32_v10 = vld [vmem:[%s1053_s0 + $0x28] sm:$0xff] }
  0x1a   :  { %265 = vmatpush.msra.mxu2 %v49_v46  ;;  %330 = vmatpush.msra.mxu3 %v50_v47  ;;  %v80_v11 = vld [vmem:[%s1054_s1 + $0x28] sm:$0xff]  ;;  %v33_v12 = vld [vmem:[%s1053_s0 + $0x30] sm:$0xff]  ;;  %v34_v14 = vld [vmem:[%s1053_s0 + $0x38] sm:$0xff] }
  0x1b   :  { %134 = vmatpush.msra.mxu0 %v99_v48  ;;  %199 = vmatpush.msra.mxu1 %v100_v49  ;;  %v81_v13 = vld [vmem:[%s1054_s1 + $0x30] sm:$0xff]  ;;  %v82_v15 = vld [vmem:[%s1054_s1 + $0x38] sm:$0xff]  ;;  %v35_v16 = vld [vmem:[%s1053_s0 + $0x40] sm:$0xff] }
  0x1c   :  { %266 = vmatpush.msra.mxu2 %v47_v50  ;;  %331 = vmatpush.msra.mxu3 %v48_v51  ;;  %v83_v17 = vld [vmem:[%s1054_s1 + $0x40] sm:$0xff]  ;;  %v36_v18 = vld [vmem:[%s1053_s0 + $0x48] sm:$0xff]  ;;  %v37_v20 = vld [vmem:[%s1053_s0 + $0x50] sm:$0xff] }
  0x1d   :  { %135 = vmatpush.msra.mxu0 %v97_v52  ;;  %200 = vmatpush.msra.mxu1 %v98_v53  ;;  %v84_v19 = vld [vmem:[%s1054_s1 + $0x48] sm:$0xff]  ;;  %v85_v21 = vld [vmem:[%s1054_s1 + $0x50] sm:$0xff]  ;;  %v38_v22 = vld [vmem:[%s1053_s0 + $0x58] sm:$0xff] }
  0x1e   :  { %267 = vmatpush.msra.mxu2 %v45_v54  ;;  %332 = vmatpush.msra.mxu3 %v46_v55  ;;  %v86_v23 = vld [vmem:[%s1054_s1 + $0x58] sm:$0xff]  ;;  %v39_v24 = vld [vmem:[%s1053_s0 + $0x60] sm:$0xff]  ;;  %v40_v26 = vld [vmem:[%s1053_s0 + $0x68] sm:$0xff] }
  0x1f   :  { %136 = vmatpush.msra.mxu0 %v95_v56  ;;  %201 = vmatpush.msra.mxu1 %v96_v57  ;;  %v87_v25 = vld [vmem:[%s1054_s1 + $0x60] sm:$0xff]  ;;  %v88_v27 = vld [vmem:[%s1054_s1 + $0x68] sm:$0xff]  ;;  %v41_v28 = vld [vmem:[%s1053_s0 + $0x70] sm:$0xff] }
  0x20   :  { %268 = vmatpush.msra.mxu2 %v43_v58  ;;  %333 = vmatpush.msra.mxu3 %v44_v59  ;;  %v89_v29 = vld [vmem:[%s1054_s1 + $0x70] sm:$0xff]  ;;  %v42_v30 = vld [vmem:[%s1053_s0 + $0x78] sm:$0xff]  ;;  %v383_v32 = vld [vmem:[%s1055_s4] sm:$0x3] }
  0x21   :  { %269 = vmatmul.f32.vlgmr.msra.gmra.mxu2 %v27_v60  ;;  %334 = vmatmul.f32.vlgmr.msra.gmra.mxu3 %v27_v60  ;;  %v90_v31 = vld [vmem:[%s1054_s1 + $0x78] sm:$0xff]  ;;  %v909_v35 = vperm.slane %v383_v32, 0  ;;  %v911_v36 = vperm.slane %v383_v32, 1  ;;  %v453_v39 = vld [vmem:[%s1056_s5] sm:$0x3] }
  0x22   :  { %137 = vmatpush.msra.mxu0 %v93_v61  ;;  %202 = vmatpush.msra.mxu1 %v94_v62  ;;  %v918_v44 = vperm.slane %v453_v39, 0  ;;  %v920_v45 = vperm.slane %v453_v39, 1 }
  0x24   :  { %138 = vmatpush.msra.mxu0 %v91_v63  ;;  %203 = vmatpush.msra.mxu1 %v92_v0 }
  0x25   :  { %139 = vmatmul.f32.vlgmr.msra.gmra.mxu0 %v75_v1  ;;  %204 = vmatmul.f32.vlgmr.msra.gmra.mxu1 %v75_v1 }
  0x29   :  { %272 = vmatmul.f32.gmra.mxu2 %v28_v2  ;;  %337 = vmatmul.f32.gmra.mxu3 %v28_v2 }
  0x2d   :  { %142 = vmatmul.f32.gmra.mxu0 %v76_v3  ;;  %207 = vmatmul.f32.gmra.mxu1 %v76_v3 }
  0x31   :  { %275 = vmatmul.f32.gmra.mxu2 %v29_v4  ;;  %340 = vmatmul.f32.gmra.mxu3 %v29_v4 }
  0x35   :  { %145 = vmatmul.f32.gmra.mxu0 %v77_v5  ;;  %210 = vmatmul.f32.gmra.mxu1 %v77_v5 }
  0x39   :  { %278 = vmatmul.f32.gmra.mxu2 %v30_v6  ;;  %343 = vmatmul.f32.gmra.mxu3 %v30_v6 }
  0x3d   :  { %148 = vmatmul.f32.gmra.mxu0 %v78_v7  ;;  %213 = vmatmul.f32.gmra.mxu1 %v78_v7 }
  0x41   :  { %281 = vmatmul.f32.gmra.mxu2 %v31_v8  ;;  %346 = vmatmul.f32.gmra.mxu3 %v31_v8 }
  0x45   :  { %151 = vmatmul.f32.gmra.mxu0 %v79_v9  ;;  %216 = vmatmul.f32.gmra.mxu1 %v79_v9 }
  0x49   :  { %284 = vmatmul.f32.gmra.mxu2 %v32_v10  ;;  %349 = vmatmul.f32.gmra.mxu3 %v32_v10 }
  0x4d   :  { %154 = vmatmul.f32.gmra.mxu0 %v80_v11  ;;  %219 = vmatmul.f32.gmra.mxu1 %v80_v11 }
  0x51   :  { %287 = vmatmul.f32.gmra.mxu2 %v33_v12  ;;  %352 = vmatmul.f32.gmra.mxu3 %v33_v12 }
  0x55   :  { %157 = vmatmul.f32.gmra.mxu0 %v81_v13  ;;  %222 = vmatmul.f32.gmra.mxu1 %v81_v13 }
  0x59   :  { %290 = vmatmul.f32.gmra.mxu2 %v34_v14  ;;  %355 = vmatmul.f32.gmra.mxu3 %v34_v14 }
  0x5d   :  { %160 = vmatmul.f32.gmra.mxu0 %v82_v15  ;;  %225 = vmatmul.f32.gmra.mxu1 %v82_v15 }
  0x61   :  { %293 = vmatmul.f32.gmra.mxu2 %v35_v16  ;;  %358 = vmatmul.f32.gmra.mxu3 %v35_v16 }
  0x65   :  { %163 = vmatmul.f32.gmra.mxu0 %v83_v17  ;;  %228 = vmatmul.f32.gmra.mxu1 %v83_v17 }
  0x69   :  { %296 = vmatmul.f32.gmra.mxu2 %v36_v18  ;;  %361 = vmatmul.f32.gmra.mxu3 %v36_v18 }
  0x6d   :  { %166 = vmatmul.f32.gmra.mxu0 %v84_v19  ;;  %231 = vmatmul.f32.gmra.mxu1 %v84_v19 }
  0x71   :  { %299 = vmatmul.f32.gmra.mxu2 %v37_v20  ;;  %364 = vmatmul.f32.gmra.mxu3 %v37_v20 }
  0x75   :  { %169 = vmatmul.f32.gmra.mxu0 %v85_v21  ;;  %234 = vmatmul.f32.gmra.mxu1 %v85_v21 }
  0x79   :  { %302 = vmatmul.f32.gmra.mxu2 %v38_v22  ;;  %367 = vmatmul.f32.gmra.mxu3 %v38_v22 }
  0x7d   :  { %172 = vmatmul.f32.gmra.mxu0 %v86_v23  ;;  %237 = vmatmul.f32.gmra.mxu1 %v86_v23 }
  0x81   :  { %305 = vmatmul.f32.gmra.mxu2 %v39_v24  ;;  %370 = vmatmul.f32.gmra.mxu3 %v39_v24 }
  0x85   :  { %175 = vmatmul.f32.gmra.mxu0 %v87_v25  ;;  %240 = vmatmul.f32.gmra.mxu1 %v87_v25 }
  0x89   :  { %308 = vmatmul.f32.gmra.mxu2 %v40_v26  ;;  %373 = vmatmul.f32.gmra.mxu3 %v40_v26 }
  0x8d   :  { %178 = vmatmul.f32.gmra.mxu0 %v88_v27  ;;  %243 = vmatmul.f32.gmra.mxu1 %v88_v27 }
  0x91   :  { %311 = vmatmul.f32.gmra.mxu2 %v41_v28  ;;  %376 = vmatmul.f32.gmra.mxu3 %v41_v28 }
  0x95   :  { %181 = vmatmul.f32.gmra.mxu0 %v89_v29  ;;  %246 = vmatmul.f32.gmra.mxu1 %v89_v29 }
  0x99   :  { %314 = vmatmul.f32.gmra.mxu2 %v42_v30  ;;  %379 = vmatmul.f32.gmra.mxu3 %v42_v30 }
  0x9d   :  { %184 = vmatmul.f32.gmra.mxu0 %v90_v31  ;;  %249 = vmatmul.f32.gmra.mxu1 %v90_v31 }
  0xa2   :  { %v140_v33 = vpop.f32.mrf.mxu0  ;;  %v205_v34 = vpop.f32.mrf.mxu1 }
  0xa4   :  { %v270_v37 = vpop.f32.mrf.mxu2  ;;  %v335_v38 = vpop.f32.mrf.mxu3 }
  0xa5   :  { %v271_v40 = vadd.f32 %v270_v37, %v140_v33  ;;  %v336_v41 = vadd.f32 %v335_v38, %v205_v34 }
  0xa7   :  { %v389_v42 = vadd.f32 %v909_v35, %v271_v40  ;;  %v390_v43 = vadd.f32 %v911_v36, %v336_v41 }
  0xa9   :  { %v421_v46 = vmax.f32 %v389_v42, 0.0  ;;  %v422_v47 = vmax.f32 %v390_v43, 0.0 }
  0xaa   :  { %v143_v48 = vpop.f32.mrf.mxu0  ;;  %v208_v49 = vpop.f32.mrf.mxu1 }
  0xab   :  { %v459_v50 = vmul.f32 %v918_v44, %v421_v46  ;;  %v460_v51 = vmul.f32 %v920_v45, %v422_v47 }
  0xac   :  { %v273_v52 = vpop.f32.mrf.mxu2  ;;  %v338_v53 = vpop.f32.mrf.mxu3 }
  0xad   :  { %v274_v54 = vadd.f32 %v273_v52, %v143_v48  ;;  %v339_v55 = vadd.f32 %v338_v53, %v208_v49  ;;  %v491_v56 = vadd.f32 %v460_v51, %v459_v50 }
  0xaf   :  { %v391_v57 = vadd.f32 %v909_v35, %v274_v54  ;;  %v392_v58 = vadd.f32 %v911_v36, %v339_v55  ;;  %492 = vadd.xlane.f32.xlu0 %v491_v56 }
  0xb1   :  { %v423_v59 = vmax.f32 %v391_v57, 0.0  ;;  %v424_v60 = vmax.f32 %v392_v58, 0.0 }
  0xb2   :  { %v146_v61 = vpop.f32.mrf.mxu0  ;;  %v211_v62 = vpop.f32.mrf.mxu1 }
  0xb3   :  { %v461_v63 = vmul.f32 %v918_v44, %v423_v59  ;;  %v462_v0 = vmul.f32 %v920_v45, %v424_v60 }
  0xb4   :  { %v276_v1 = vpop.f32.mrf.mxu2  ;;  %v341_v2 = vpop.f32.mrf.mxu3 }
  0xb5   :  { %v277_v3 = vadd.f32 %v276_v1, %v146_v61  ;;  %v342_v4 = vadd.f32 %v341_v2, %v211_v62  ;;  %v494_v5 = vadd.f32 %v462_v0, %v461_v63 }
  0xb7   :  { %v393_v6 = vadd.f32 %v909_v35, %v277_v3  ;;  %v394_v7 = vadd.f32 %v911_v36, %v342_v4  ;;  %495 = vadd.xlane.f32.xlu0 %v494_v5 }
  0xb9   :  { %v425_v8 = vmax.f32 %v393_v6, 0.0  ;;  %v426_v9 = vmax.f32 %v394_v7, 0.0 }
  0xba   :  { %v149_v10 = vpop.f32.mrf.mxu0  ;;  %v214_v11 = vpop.f32.mrf.mxu1 }
  0xbb   :  { %v463_v12 = vmul.f32 %v918_v44, %v425_v8  ;;  %v464_v13 = vmul.f32 %v920_v45, %v426_v9 }
  0xbc   :  { %v279_v14 = vpop.f32.mrf.mxu2  ;;  %v344_v15 = vpop.f32.mrf.mxu3 }
  0xbd   :  { %v280_v16 = vadd.f32 %v279_v14, %v149_v10  ;;  %v345_v17 = vadd.f32 %v344_v15, %v214_v11  ;;  %v497_v18 = vadd.f32 %v464_v13, %v463_v12 }
  0xbf   :  { %v395_v19 = vadd.f32 %v909_v35, %v280_v16  ;;  %v396_v20 = vadd.f32 %v911_v36, %v345_v17  ;;  %498 = vadd.xlane.f32.xlu1 %v497_v18 }
  0xc1   :  { %v427_v21 = vmax.f32 %v395_v19, 0.0  ;;  %v428_v22 = vmax.f32 %v396_v20, 0.0 }
  0xc2   :  { %v152_v23 = vpop.f32.mrf.mxu0  ;;  %v217_v24 = vpop.f32.mrf.mxu1 }
  0xc3   :  { %v465_v25 = vmul.f32 %v918_v44, %v427_v21  ;;  %v466_v26 = vmul.f32 %v920_v45, %v428_v22 }
  0xc4   :  { %v282_v27 = vpop.f32.mrf.mxu2  ;;  %v347_v28 = vpop.f32.mrf.mxu3 }
  0xc5   :  { %v283_v29 = vadd.f32 %v282_v27, %v152_v23  ;;  %v348_v30 = vadd.f32 %v347_v28, %v217_v24  ;;  %v500_v31 = vadd.f32 %v466_v26, %v465_v25 }
  0xc7   :  { %v397_v32 = vadd.f32 %v909_v35, %v283_v29  ;;  %v398_v33 = vadd.f32 %v911_v36, %v348_v30  ;;  %501 = vadd.xlane.f32.xlu1 %v500_v31 }
  0xc9   :  { %v429_v34 = vmax.f32 %v397_v32, 0.0  ;;  %v430_v37 = vmax.f32 %v398_v33, 0.0 }
  0xca   :  { %v155_v38 = vpop.f32.mrf.mxu0  ;;  %v220_v39 = vpop.f32.mrf.mxu1 }
  0xcb   :  { %v467_v40 = vmul.f32 %v918_v44, %v429_v34  ;;  %v468_v41 = vmul.f32 %v920_v45, %v430_v37 }
  0xcc   :  { %v285_v42 = vpop.f32.mrf.mxu2  ;;  %v350_v43 = vpop.f32.mrf.mxu3 }
  0xcd   :  { %v286_v46 = vadd.f32 %v285_v42, %v155_v38  ;;  %v351_v47 = vadd.f32 %v350_v43, %v220_v39  ;;  %v503_v48 = vadd.f32 %v468_v41, %v467_v40 }
  0xcf   :  { %v399_v49 = vadd.f32 %v909_v35, %v286_v46  ;;  %v400_v50 = vadd.f32 %v911_v36, %v351_v47  ;;  %504 = vadd.xlane.f32.xlu2 %v503_v48 }
  0xd1   :  { %v431_v51 = vmax.f32 %v399_v49, 0.0  ;;  %v432_v52 = vmax.f32 %v400_v50, 0.0 }
  0xd2   :  { %v158_v53 = vpop.f32.mrf.mxu0  ;;  %v223_v54 = vpop.f32.mrf.mxu1 }
  0xd3   :  { %v469_v55 = vmul.f32 %v918_v44, %v431_v51  ;;  %v470_v56 = vmul.f32 %v920_v45, %v432_v52 }
  0xd4   :  { %v288_v57 = vpop.f32.mrf.mxu2  ;;  %v353_v58 = vpop.f32.mrf.mxu3 }
  0xd5   :  { %v289_v59 = vadd.f32 %v288_v57, %v158_v53  ;;  %v354_v60 = vadd.f32 %v353_v58, %v223_v54  ;;  %v506_v61 = vadd.f32 %v470_v56, %v469_v55 }
  0xd7   :  { %v401_v62 = vadd.f32 %v909_v35, %v289_v59  ;;  %v402_v63 = vadd.f32 %v911_v36, %v354_v60  ;;  %507 = vadd.xlane.f32.xlu2 %v506_v61 }
  0xd9   :  { %v433_v0 = vmax.f32 %v401_v62, 0.0  ;;  %v434_v1 = vmax.f32 %v402_v63, 0.0 }
  0xda   :  { %v161_v2 = vpop.f32.mrf.mxu0  ;;  %v226_v3 = vpop.f32.mrf.mxu1 }
  0xdb   :  { %v471_v4 = vmul.f32 %v918_v44, %v433_v0  ;;  %v472_v5 = vmul.f32 %v920_v45, %v434_v1 }
  0xdc   :  { %v291_v6 = vpop.f32.mrf.mxu2  ;;  %v356_v7 = vpop.f32.mrf.mxu3 }
  0xdd   :  { %v292_v8 = vadd.f32 %v291_v6, %v161_v2  ;;  %v357_v9 = vadd.f32 %v356_v7, %v226_v3  ;;  %v509_v10 = vadd.f32 %v472_v5, %v471_v4 }
  0xdf   :  { %v403_v11 = vadd.f32 %v909_v35, %v292_v8  ;;  %v404_v12 = vadd.f32 %v911_v36, %v357_v9  ;;  %510 = vadd.xlane.f32.xlu0 %v509_v10 }
  0xe1   :  { %v435_v13 = vmax.f32 %v403_v11, 0.0  ;;  %v436_v14 = vmax.f32 %v404_v12, 0.0 }
  0xe2   :  { %v164_v15 = vpop.f32.mrf.mxu0  ;;  %v229_v16 = vpop.f32.mrf.mxu1 }
  0xe3   :  { %v473_v17 = vmul.f32 %v918_v44, %v435_v13  ;;  %v474_v18 = vmul.f32 %v920_v45, %v436_v14 }
  0xe4   :  { %v294_v19 = vpop.f32.mrf.mxu2  ;;  %v359_v20 = vpop.f32.mrf.mxu3 }
  0xe5   :  { %v295_v21 = vadd.f32 %v294_v19, %v164_v15  ;;  %v360_v22 = vadd.f32 %v359_v20, %v229_v16  ;;  %v512_v23 = vadd.f32 %v474_v18, %v473_v17 }
  0xe7   :  { %v405_v24 = vadd.f32 %v909_v35, %v295_v21  ;;  %v406_v25 = vadd.f32 %v911_v36, %v360_v22  ;;  %513 = vadd.xlane.f32.xlu1 %v512_v23 }
  0xe9   :  { %v437_v26 = vmax.f32 %v405_v24, 0.0  ;;  %v438_v27 = vmax.f32 %v406_v25, 0.0 }
  0xea   :  { %v167_v28 = vpop.f32.mrf.mxu0  ;;  %v232_v29 = vpop.f32.mrf.mxu1 }
  0xeb   :  { %v475_v30 = vmul.f32 %v918_v44, %v437_v26  ;;  %v476_v31 = vmul.f32 %v920_v45, %v438_v27 }
  0xec   :  { %v297_v32 = vpop.f32.mrf.mxu2  ;;  %v362_v33 = vpop.f32.mrf.mxu3 }
  0xed   :  { %v298_v34 = vadd.f32 %v297_v32, %v167_v28  ;;  %v363_v37 = vadd.f32 %v362_v33, %v232_v29  ;;  %v515_v38 = vadd.f32 %v476_v31, %v475_v30 }
  0xef   :  { %v407_v39 = vadd.f32 %v909_v35, %v298_v34  ;;  %v408_v40 = vadd.f32 %v911_v36, %v363_v37  ;;  %516 = vadd.xlane.f32.xlu2 %v515_v38 }
  0xf1   :  { %v439_v41 = vmax.f32 %v407_v39, 0.0  ;;  %v440_v42 = vmax.f32 %v408_v40, 0.0 }
  0xf2   :  { %v170_v43 = vpop.f32.mrf.mxu0  ;;  %v235_v46 = vpop.f32.mrf.mxu1 }
  0xf3   :  { %v477_v47 = vmul.f32 %v918_v44, %v439_v41  ;;  %v478_v48 = vmul.f32 %v920_v45, %v440_v42 }
  0xf4   :  { %v300_v49 = vpop.f32.mrf.mxu2  ;;  %v365_v50 = vpop.f32.mrf.mxu3 }
  0xf5   :  { %v301_v51 = vadd.f32 %v300_v49, %v170_v43  ;;  %v366_v52 = vadd.f32 %v365_v50, %v235_v46  ;;  %v518_v53 = vadd.f32 %v478_v48, %v477_v47 }
  0xf7   :  { %v409_v54 = vadd.f32 %v909_v35, %v301_v51  ;;  %v410_v55 = vadd.f32 %v911_v36, %v366_v52  ;;  %519 = vadd.xlane.f32.xlu0 %v518_v53 }
  0xf9   :  { %v441_v56 = vmax.f32 %v409_v54, 0.0  ;;  %v442_v57 = vmax.f32 %v410_v55, 0.0 }
  0xfa   :  { %v173_v58 = vpop.f32.mrf.mxu0  ;;  %v238_v59 = vpop.f32.mrf.mxu1 }
  0xfb   :  { %v479_v60 = vmul.f32 %v918_v44, %v441_v56  ;;  %v480_v61 = vmul.f32 %v920_v45, %v442_v57 }
  0xfc   :  { %v303_v62 = vpop.f32.mrf.mxu2  ;;  %v368_v63 = vpop.f32.mrf.mxu3 }
  0xfd   :  { %v304_v0 = vadd.f32 %v303_v62, %v173_v58  ;;  %v369_v1 = vadd.f32 %v368_v63, %v238_v59  ;;  %v521_v2 = vadd.f32 %v480_v61, %v479_v60  ;;  %v540_v61 = vstv %s1057_s6 }
  0xff   :  { %v411_v3 = vadd.f32 %v909_v35, %v304_v0  ;;  %v412_v4 = vadd.f32 %v911_v36, %v369_v1  ;;  %522 = vadd.xlane.f32.xlu1 %v521_v2 }
 0x101   :  { %v443_v5 = vmax.f32 %v411_v3, 0.0  ;;  %v444_v6 = vmax.f32 %v412_v4, 0.0 }
 0x102   :  { %v176_v7 = vpop.f32.mrf.mxu0  ;;  %v241_v8 = vpop.f32.mrf.mxu1 }
 0x103   :  { %v481_v9 = vmul.f32 %v918_v44, %v443_v5  ;;  %v482_v10 = vmul.f32 %v920_v45, %v444_v6 }
 0x104   :  { %v306_v11 = vpop.f32.mrf.mxu2  ;;  %v371_v12 = vpop.f32.mrf.mxu3 }
 0x105   :  { %v307_v13 = vadd.f32 %v306_v11, %v176_v7  ;;  %v372_v14 = vadd.f32 %v371_v12, %v241_v8  ;;  %v524_v15 = vadd.f32 %v482_v10, %v481_v9 }
 0x107   :  { %v413_v16 = vadd.f32 %v909_v35, %v307_v13  ;;  %v414_v17 = vadd.f32 %v911_v36, %v372_v14  ;;  %525 = vadd.xlane.f32.xlu2 %v524_v15 }
 0x109   :  { %v445_v18 = vmax.f32 %v413_v16, 0.0  ;;  %v446_v19 = vmax.f32 %v414_v17, 0.0 }
 0x10a   :  { %v179_v20 = vpop.f32.mrf.mxu0  ;;  %v244_v21 = vpop.f32.mrf.mxu1 }
 0x10b   :  { %v483_v22 = vmul.f32 %v918_v44, %v445_v18  ;;  %v484_v23 = vmul.f32 %v920_v45, %v446_v19 }
 0x10c   :  { %v309_v24 = vpop.f32.mrf.mxu2  ;;  %v374_v25 = vpop.f32.mrf.mxu3 }
 0x10d   :  { %v310_v26 = vadd.f32 %v309_v24, %v179_v20  ;;  %v375_v27 = vadd.f32 %v374_v25, %v244_v21  ;;  %v527_v28 = vadd.f32 %v484_v23, %v483_v22 }
 0x10f   :  { %v415_v29 = vadd.f32 %v909_v35, %v310_v26  ;;  %v416_v30 = vadd.f32 %v911_v36, %v375_v27  ;;  %528 = vadd.xlane.f32.xlu0 %v527_v28 }
 0x111   :  { %v447_v31 = vmax.f32 %v415_v29, 0.0  ;;  %v448_v32 = vmax.f32 %v416_v30, 0.0 }
 0x112   :  { %v182_v33 = vpop.f32.mrf.mxu0  ;;  %v247_v34 = vpop.f32.mrf.mxu1 }
 0x113   :  { %v485_v37 = vmul.f32 %v918_v44, %v447_v31  ;;  %v486_v38 = vmul.f32 %v920_v45, %v448_v32 }
 0x114   :  { %v312_v39 = vpop.f32.mrf.mxu2  ;;  %v377_v40 = vpop.f32.mrf.mxu3 }
 0x115   :  { %v313_v41 = vadd.f32 %v312_v39, %v182_v33  ;;  %v378_v42 = vadd.f32 %v377_v40, %v247_v34  ;;  %v530_v43 = vadd.f32 %v486_v38, %v485_v37 }
 0x117   :  { %v417_v46 = vadd.f32 %v909_v35, %v313_v41  ;;  %v418_v47 = vadd.f32 %v911_v36, %v378_v42  ;;  %531 = vadd.xlane.f32.xlu1 %v530_v43 }
 0x119   :  { %v449_v48 = vmax.f32 %v417_v46, 0.0  ;;  %v450_v49 = vmax.f32 %v418_v47, 0.0 }
 0x11a   :  { %v185_v50 = vpop.f32.mrf.mxu0  ;;  %v250_v51 = vpop.f32.mrf.mxu1 }
 0x11b   :  { %v487_v52 = vmul.f32 %v918_v44, %v449_v48  ;;  %v488_v53 = vmul.f32 %v920_v45, %v450_v49 }
 0x11c   :  { %v315_v54 = vpop.f32.mrf.mxu2  ;;  %v380_v55 = vpop.f32.mrf.mxu3 }
 0x11d   :  { %v316_v56 = vadd.f32 %v315_v54, %v185_v50  ;;  %v381_v57 = vadd.f32 %v380_v55, %v250_v51  ;;  %v533_v58 = vadd.f32 %v488_v53, %v487_v52 }
 0x11f   :  { %v419_v59 = vadd.f32 %v909_v35, %v316_v56  ;;  %v420_v60 = vadd.f32 %v911_v36, %v381_v57  ;;  %534 = vadd.xlane.f32.xlu2 %v533_v58 }
 0x121   :  { %v451_v62 = vmax.f32 %v419_v59, 0.0  ;;  %v452_v63 = vmax.f32 %v420_v60, 0.0 }
 0x122   :  { %v493_v0 = vpop.xlane.xlu0 %492 }
 0x123   :  { %v541_v1 = vadd.f32 %v540_v61, %v493_v0  ;;  %v489_v2 = vmul.f32 %v918_v44, %v451_v62  ;;  %v490_v3 = vmul.f32 %v920_v45, %v452_v63 }
 0x125   :  { %558 = vst.msk [vmem:[%s1058_s7] sm:$0xff] %vm557_vm0, %v541_v1  ;;  %v536_v35 = vadd.f32 %v490_v3, %v489_v2 }
 0x127   :  { %537 = vadd.xlane.f32.xlu0 %v536_v35 }
 0x12a   :  { %v496_v36 = vpop.xlane.xlu0 %495 }
 0x12b   :  { %v542_v4 = vadd.f32 %v540_v61, %v496_v36 }
 0x12d   :  { %559 = vst.msk [vmem:[%s1058_s7 + $0x8] sm:$0xff] %vm557_vm0, %v542_v4 }
 0x132   :  { %v499_v5 = vpop.xlane.xlu1 %498 }
 0x133   :  { %v543_v6 = vadd.f32 %v540_v61, %v499_v5 }
 0x135   :  { %560 = vst.msk [vmem:[%s1058_s7 + $0x10] sm:$0xff] %vm557_vm0, %v543_v6 }
 0x13a   :  { %v502_v44 = vpop.xlane.xlu1 %501 }
 0x13b   :  { %v544_v45 = vadd.f32 %v540_v61, %v502_v44 }
 0x13d   :  { %561 = vst.msk [vmem:[%s1058_s7 + $0x18] sm:$0xff] %vm557_vm0, %v544_v45 }
 0x142   :  { %v505_v7 = vpop.xlane.xlu2 %504 }
 0x143   :  { %v545_v8 = vadd.f32 %v540_v61, %v505_v7 }
 0x145   :  { %562 = vst.msk [vmem:[%s1058_s7 + $0x20] sm:$0xff] %vm557_vm0, %v545_v8 }
 0x14a   :  { %v508_v9 = vpop.xlane.xlu2 %507 }
 0x14b   :  { %v546_v10 = vadd.f32 %v540_v61, %v508_v9 }
 0x14d   :  { %563 = vst.msk [vmem:[%s1058_s7 + $0x28] sm:$0xff] %vm557_vm0, %v546_v10 }
 0x152   :  { %v511_v11 = vpop.xlane.xlu0 %510 }
 0x153   :  { %v547_v12 = vadd.f32 %v540_v61, %v511_v11 }
 0x155   :  { %564 = vst.msk [vmem:[%s1058_s7 + $0x30] sm:$0xff] %vm557_vm0, %v547_v12 }
 0x15a   :  { %v514_v13 = vpop.xlane.xlu1 %513 }
 0x15b   :  { %v548_v14 = vadd.f32 %v540_v61, %v514_v13 }
 0x15d   :  { %565 = vst.msk [vmem:[%s1058_s7 + $0x38] sm:$0xff] %vm557_vm0, %v548_v14 }
 0x162   :  { %v517_v15 = vpop.xlane.xlu2 %516 }
 0x163   :  { %v549_v16 = vadd.f32 %v540_v61, %v517_v15 }
 0x165   :  { %566 = vst.msk [vmem:[%s1058_s7 + $0x40] sm:$0xff] %vm557_vm0, %v549_v16 }
 0x16a   :  { %v520_v17 = vpop.xlane.xlu0 %519 }
 0x16b   :  { %v550_v18 = vadd.f32 %v540_v61, %v520_v17 }
 0x16d   :  { %567 = vst.msk [vmem:[%s1058_s7 + $0x48] sm:$0xff] %vm557_vm0, %v550_v18 }
 0x172   :  { %v523_v19 = vpop.xlane.xlu1 %522 }
 0x173   :  { %v551_v20 = vadd.f32 %v540_v61, %v523_v19 }
 0x175   :  { %568 = vst.msk [vmem:[%s1058_s7 + $0x50] sm:$0xff] %vm557_vm0, %v551_v20 }
 0x17a   :  { %v526_v21 = vpop.xlane.xlu2 %525 }
 0x17b   :  { %v552_v22 = vadd.f32 %v540_v61, %v526_v21 }
 0x17d   :  { %569 = vst.msk [vmem:[%s1058_s7 + $0x58] sm:$0xff] %vm557_vm0, %v552_v22 }
 0x182   :  { %v529_v23 = vpop.xlane.xlu0 %528 }
 0x183   :  { %v553_v24 = vadd.f32 %v540_v61, %v529_v23 }
 0x185   :  { %570 = vst.msk [vmem:[%s1058_s7 + $0x60] sm:$0xff] %vm557_vm0, %v553_v24 }
 0x18a   :  { %v532_v25 = vpop.xlane.xlu1 %531 }
 0x18b   :  { %v554_v26 = vadd.f32 %v540_v61, %v532_v25 }
 0x18d   :  { %571 = vst.msk [vmem:[%s1058_s7 + $0x68] sm:$0xff] %vm557_vm0, %v554_v26 }
 0x192   :  { %v535_v27 = vpop.xlane.xlu2 %534 }
 0x193   :  { %v555_v28 = vadd.f32 %v540_v61, %v535_v27 }
 0x195   :  { %572 = vst.msk [vmem:[%s1058_s7 + $0x70] sm:$0xff] %vm557_vm0, %v555_v28 }
 0x19a   :  { %v538_v29 = vpop.xlane.xlu0 %537 }
 0x19b   :  { %v556_v30 = vadd.f32 %v540_v61, %v538_v29 }
 0x19d   :  { %573 = vst.msk [vmem:[%s1058_s7 + $0x78] sm:$0xff] %vm557_vm0, %v556_v30 }

</bundles_post_ra>
